<compile_context>
chip_gen: v5e
topology: v5e:2x2
jax: 0.10.0
libtpu: 0.0.40
codegen_flags: <defaults>
</compile_context>

<pallas_src>
import jax
import jax.numpy as jnp
from jax.experimental import pallas as pl
from jax.experimental.pallas import tpu as pltpu

EPS = 1e-6  # LayerNorm2d eps

# Slots inside the packed per-channel vector slab (N_SLOTS, 2C, 1).
S_INTRO_B = 0
S_END_B = 1
S_N1W = 2
S_N1B = 3
S_B1 = 4
S_B2 = 5
S_SCB = 6
S_B3 = 7
S_BETA = 8
S_N2W = 9
S_N2B = 10
S_B4 = 11
S_B5 = 12
S_GAMMA = 13
S_DW = 14            # slots 14..22: the 9 depthwise-3x3 taps (kh-major, kw-minor)
N_SLOTS = S_DW + 9


def _round_up8(n):
    return ((n + 7) // 8) * 8


# ---------------------------------------------------------------------------
# Fused forward kernel: one grid step == one image, everything in (C, HW).
# ---------------------------------------------------------------------------
def _make_kernel(H, W, C, CIN):
    HW = H * W
    C2 = 2 * C

    def kernel(x_ref, iw_ref, ew_ref, mats_ref, vecs_ref, o_ref):
        x_pad = x_ref[0]                        # (CP, HW); rows >= CIN are zero
        mm = mats_ref[...]                      # (7C, C) packed 1x1 weights^T

        def col(slot, n=C):                     # (n, 1) per-channel column
            return vecs_ref[slot, 0:n, :]       # lane-size-1 broadcast over HW

        # ---- zero-padded 3x3 shift machinery: lane rolls + boundary masks ----
        pos = jax.lax.broadcasted_iota(jnp.int32, (1, HW), 1)
        if (W & (W - 1)) == 0:
            w_idx = pos & (W - 1)
        else:
            # TODO(synk): verify vector int-div lowering for non-pow2 W.
            w_idx = pos - (pos // W) * W

        taps = []                                # [(flat shift d, mask or None)]
        for kh in range(3):
            for kw in range(3):
                dh, dw = kh - 1, kw - 1
                conds = []
                if dh == -1:
                    conds.append(pos >= W)
                elif dh == 1:
                    conds.append(pos < (H - 1) * W)
                if dw == -1:
                    conds.append(w_idx >= 1)
                elif dw == 1:
                    conds.append(w_idx < W - 1)
                mask = None
                for cnd in conds:
                    mask = cnd if mask is None else (mask & cnd)
                taps.append((dh * W + dw, mask))

        def shifted(v, d, mask):
            if d == 0:
                return v
            r = pltpu.roll(v, (-d) % HW, 1)      # XLU lane rotate, off VPU path
            return jnp.where(mask, r, 0.0)

        def conv3x3_im2col(v, w_slab):
            # (rows*9, HW) slab (sublane-aligned blocks), one MXU matmul.
            slab = jnp.concatenate([shifted(v, d, m) for (d, m) in taps], axis=0)
            return jnp.dot(w_slab, slab, preferred_element_type=jnp.float32)

        # ---- intro: 3x3 conv (CIN -> C), single im2col matmul ----------------
        feat = conv3x3_im2col(x_pad, iw_ref[...]) + col(S_INTRO_B)   # (C, HW)

        # ---- NAFBlock ---------------------------------------------------------
        def layer_norm(v, wcol, bcol):           # LayerNorm2d: across channels
            mu = jnp.mean(v, axis=0, keepdims=True)
            var = jnp.mean((v - mu) ** 2, axis=0, keepdims=True)
            return (v - mu) * jax.lax.rsqrt(var + EPS) * wcol + bcol

        # branch 1: norm1 -> conv1(1x1) -> dwconv3x3 -> SimpleGate -> SCA -> conv3
        xn = layer_norm(feat, col(S_N1W), col(S_N1B))
        t1 = jnp.dot(mm[0:C2, :], xn, preferred_element_type=jnp.float32)
        t1 = t1 + col(S_B1, C2)                                       # (2C, HW)

        dacc = None                               # depthwise 3x3 (zero pad 1)
        for t, (d, m) in enumerate(taps):
            contrib = shifted(t1, d, m) * col(S_DW + t, C2)
            dacc = contrib if dacc is None else dacc + contrib
        t1 = dacc + col(S_B2, C2)

        g = t1[0:C, :] * t1[C:C2, :]                                  # SimpleGate
        # SCA: conv1x1(avgpool(g)) == avgpool(conv1x1(g)) by linearity.
        sg = jnp.dot(mm[C2:3 * C, :], g, preferred_element_type=jnp.float32)
        s = jnp.mean(sg, axis=1, keepdims=True) + col(S_SCB)          # (C, 1)
        g = g * s                                                     # channel attn
        u = jnp.dot(mm[3 * C:4 * C, :], g, preferred_element_type=jnp.float32)
        y = feat + (u + col(S_B3)) * col(S_BETA)                      # dropout1=Id

        # branch 2: norm2 -> conv4(1x1) -> SimpleGate -> conv5(1x1)
        yn = layer_norm(y, col(S_N2W), col(S_N2B))
        t2 = jnp.dot(mm[4 * C:6 * C, :], yn, preferred_element_type=jnp.float32)
        t2 = t2 + col(S_B4, C2)
        g2 = t2[0:C, :] * t2[C:C2, :]
        u2 = jnp.dot(mm[6 * C:7 * C, :], g2, preferred_element_type=jnp.float32)
        blk = y + (u2 + col(S_B5)) * col(S_GAMMA)                     # dropout2=Id

        # ---- ending: 3x3 conv (C -> CIN) + global residual, lane-dense store --
        out = conv3x3_im2col(blk, ew_ref[...])                        # (CIN, HW)
        o_ref[0] = out + col(S_END_B, CIN) + x_pad[0:CIN, :]

    return kernel


def nafnet_fused(x_pad, iw, ew, mats, vecs, *, H, W, cin):
    B, cp, HW = x_pad.shape
    C = mats.shape[1]
    kernel = _make_kernel(H, W, C, cin)
    return pl.pallas_call(
        kernel,
        out_shape=jax.ShapeDtypeStruct((B, cin, HW), jnp.float32),
        grid_spec=pltpu.PrefetchScalarGridSpec(
            num_scalar_prefetch=0,
            grid=(B,),
            in_specs=[
                pl.BlockSpec((1, cp, HW), lambda i: (i, 0, 0)),
                pl.BlockSpec(iw.shape, lambda i: (0, 0)),
                pl.BlockSpec(ew.shape, lambda i: (0, 0)),
                pl.BlockSpec(mats.shape, lambda i: (0, 0)),
                pl.BlockSpec(vecs.shape, lambda i: (0, 0, 0)),
            ],
            out_specs=pl.BlockSpec((1, cin, HW), lambda i: (i, 0, 0)),
        ),
        compiler_params=pltpu.CompilerParams(
            dimension_semantics=("parallel",)),   # v7x: shard batch over 2 TCs
    )(x_pad, iw, ew, mats, vecs)


# ---------------------------------------------------------------------------
# Parameter init (deterministic; 1x1 convs as (Cin,Cout), 3x3 convs as
# (3,3,Cin,Cout), depthwise 3x3 as (3,3,2C)) -- same as the reference layout.
# ---------------------------------------------------------------------------
def init_params(key, img_channel=3, width=16):
    c = width
    dw = 2 * c      # DW_Expand = 2
    ffn = 2 * c     # FFN_Expand = 2
    keys = iter(jax.random.split(key, 24))

    def w(shape, scale=0.1):
        return (scale * jax.random.normal(next(keys), shape)).astype(jnp.float32)

    return {
        "intro_w": w((3, 3, img_channel, c)),
        "intro_b": w((1, c)),
        "end_w": w((3, 3, c, img_channel)),
        "end_b": w((1, img_channel)),
        "blk": {
            "n1w": jnp.ones((1, c), jnp.float32),
            "n1b": jnp.zeros((1, c), jnp.float32),
            "w1": w((c, dw)),
            "b1": w((1, dw)),
            "w2": w((3, 3, dw)),
            "b2": w((1, dw)),
            "scw": w((dw // 2, dw // 2)),
            "scb": w((1, dw // 2)),
            "w3": w((dw // 2, c)),
            "b3": w((1, c)),
            "n2w": jnp.ones((1, c), jnp.float32),
            "n2b": jnp.zeros((1, c), jnp.float32),
            "w4": w((c, ffn)),
            "b4": w((1, ffn)),
            "w5": w((ffn // 2, c)),
            "b5": w((1, c)),
            # beta/gamma are zero-init in the module; nonzero here so the
            # residual branches are numerically exercised.
            "beta": w((1, c)),
            "gamma": w((1, c)),
        },
    }


def pack_params(params):
    """Pack params into kernel-layout slabs (transposed, lane-dense friendly)."""
    blk = params["blk"]
    c = params["intro_w"].shape[3]
    cin = params["intro_w"].shape[2]
    cp = _round_up8(cin)
    c2 = 2 * c
    kh_kw = [(kh, kw) for kh in range(3) for kw in range(3)]

    # intro 3x3 -> (C, 9*CP) im2col weights, column = tap*CP + in_channel.
    iw = jnp.transpose(params["intro_w"], (3, 0, 1, 2)).reshape(c, 9, cin)
    iw = jnp.pad(iw, ((0, 0), (0, 0), (0, cp - cin))).reshape(c, 9 * cp)

    # ending 3x3 -> (CIN, 9*C) im2col weights, column = tap*C + in_channel.
    ew = jnp.transpose(params["end_w"], (3, 0, 1, 2)).reshape(cin, 9 * c)

    # 1x1 conv weights, pre-transposed to (Cout, Cin), stacked on rows.
    mats = jnp.concatenate([
        blk["w1"].T,     # rows 0   : 2C
        blk["scw"].T,    # rows 2C  : 3C
        blk["w3"].T,     # rows 3C  : 4C
        blk["w4"].T,     # rows 4C  : 6C
        blk["w5"].T,     # rows 6C  : 7C
    ], axis=0)

    # per-channel vectors -> (N_SLOTS, 2C, 1) column slab (lane-0 broadcasts).
    def slot(v):
        v = v.reshape(-1)
        return jnp.pad(v, (0, c2 - v.shape[0])).reshape(c2, 1)

    slots = [
        slot(params["intro_b"]), slot(params["end_b"]),
        slot(blk["n1w"]), slot(blk["n1b"]),
        slot(blk["b1"]), slot(blk["b2"]),
        slot(blk["scb"]), slot(blk["b3"]), slot(blk["beta"]),
        slot(blk["n2w"]), slot(blk["n2b"]),
        slot(blk["b4"]), slot(blk["b5"]), slot(blk["gamma"]),
    ] + [slot(blk["w2"][kh, kw]) for (kh, kw) in kh_kw]
    vecs = jnp.stack(slots, axis=0)

    return (iw.astype(jnp.float32), ew.astype(jnp.float32),
            mats.astype(jnp.float32), vecs.astype(jnp.float32))


# ---------------------------------------------------------------------------
# Full NAFNet forward (default config). padder_size == 1 so check_image_size
# and the final crop are identities.  I/O stays in (B, C, H*W) -- a free
# reshape of NCHW -- so the kernel output store is lane-dense.
# ---------------------------------------------------------------------------
def nafnet_forward(x_nchw, params):
    B, CIN, H, W = x_nchw.shape
    cp = _round_up8(CIN)
    x = x_nchw.reshape(B, CIN, H * W).astype(jnp.float32)
    x = jnp.pad(x, ((0, 0), (0, cp - CIN), (0, 0)))      # sublane-align channels
    iw, ew, mats, vecs = pack_params(params)
    out = nafnet_fused(x, iw, ew, mats, vecs, H=H, W=W, cin=CIN)
    return out.reshape(B, CIN, H, W)


# ---------------------------------------------------------------------------
# Pure-JAX reference (NHWC math) to sanity-check the fused kernel.
# ---------------------------------------------------------------------------
def _conv3x3_ref(x, w, b):
    B, H, W, Cin = x.shape
    xp = jnp.pad(x, ((0, 0), (1, 1), (1, 1), (0, 0)))
    out = jnp.zeros((B, H, W, w.shape[-1]), jnp.float32)
    for kh in range(3):
        for kw in range(3):
            out = out + jnp.einsum("bhwc,cd->bhwd",
                                   xp[:, kh:kh + H, kw:kw + W, :], w[kh, kw])
    return out + b[0]


def _nafblock_ref(x, p):
    B, H, W, C = x.shape

    def ln(v, wgt, bias):
        mu = v.mean(-1, keepdims=True)
        var = ((v - mu) ** 2).mean(-1, keepdims=True)
        return (v - mu) * jax.lax.rsqrt(var + EPS) * wgt + bias

    xn = ln(x, p["n1w"][0], p["n1b"][0])
    t = jnp.einsum("bhwc,cd->bhwd", xn, p["w1"]) + p["b1"][0]
    tp = jnp.pad(t, ((0, 0), (1, 1), (1, 1), (0, 0)))
    acc = jnp.zeros_like(t)
    for kh in range(3):
        for kw in range(3):
            acc = acc + tp[:, kh:kh + H, kw:kw + W, :] * p["w2"][kh, kw]
    t = acc + p["b2"][0]
    g = t[..., :C] * t[..., C:]
    s = g.mean(axis=(1, 2)) @ p["scw"] + p["scb"][0]
    g = g * s[:, None, None, :]
    u = jnp.einsum("bhwc,cd->bhwd", g, p["w3"]) + p["b3"][0]
    y = x + u * p["beta"][0]
    yn = ln(y, p["n2w"][0], p["n2b"][0])
    t = jnp.einsum("bhwc,cd->bhwd", yn, p["w4"]) + p["b4"][0]
    g = t[..., :C] * t[..., C:]
    u = jnp.einsum("bhwc,cd->bhwd", g, p["w5"]) + p["b5"][0]
    return y + u * p["gamma"][0]


def nafnet_ref(x_nchw, params):
    x = jnp.transpose(x_nchw, (0, 2, 3, 1)).astype(jnp.float32)
    f = _conv3x3_ref(x, params["intro_w"], params["intro_b"])
    f = _nafblock_ref(f, params["blk"])
    out = _conv3x3_ref(f, params["end_w"], params["end_b"]) + x
    return jnp.transpose(out, (0, 3, 1, 2))


if __name__ == "__main__":
    key = jax.random.PRNGKey(0)
    pkey, xkey = jax.random.split(key)
    params = init_params(pkey, img_channel=3, width=16)
    # PyTorch-convention NCHW input: (B=2, C=3, H=16, W=16)
    x = jax.random.normal(xkey, (2, 3, 16, 16), jnp.float32)

    out = jax.block_until_ready(nafnet_forward(x, params))
    ref = jax.block_until_ready(nafnet_ref(x, params))

    assert out.shape == (2, 3, 16, 16)
    max_err = float(jnp.max(jnp.abs(out - ref)))
    assert jnp.allclose(out, ref, atol=1e-3, rtol=1e-3), max_err
    print("KERNEL_OK")
</pallas_src>

<mosaic_0001>
module attributes {stable_mosaic.version = 11 : i64} {
  func.func @kernel(%arg0: i32, %arg1: memref<1x8x256xf32, #tpu.memory_space<vmem>>, %arg2: memref<16x72xf32, #tpu.memory_space<vmem>>, %arg3: memref<3x144xf32, #tpu.memory_space<vmem>>, %arg4: memref<112x16xf32, #tpu.memory_space<vmem>>, %arg5: memref<23x32x1xf32, #tpu.memory_space<vmem>>, %arg6: memref<1x3x256xf32, #tpu.memory_space<vmem>>) attributes {dimension_semantics = [#tpu.dimension_semantics<parallel>], iteration_bounds = array<i64: 2>, scalar_prefetch = 0 : i64, scratch_operands = 0 : i64, tpu.core_type = #tpu.core_type<tc>, window_params = [{transform_indices = @transform_0, window_bounds = array<i64: 1, 8, 256>}, {pipeline_mode = #tpu.pipeline_mode<synchronous>, transform_indices = @transform_1, window_bounds = array<i64: 16, 72>}, {pipeline_mode = #tpu.pipeline_mode<synchronous>, transform_indices = @transform_2, window_bounds = array<i64: 3, 144>}, {pipeline_mode = #tpu.pipeline_mode<synchronous>, transform_indices = @transform_3, window_bounds = array<i64: 112, 16>}, {pipeline_mode = #tpu.pipeline_mode<synchronous>, transform_indices = @transform_4, window_bounds = array<i64: 23, 32, 1>}, {transform_indices = @transform_5, window_bounds = array<i64: 1, 3, 256>}]} {
    %c0 = arith.constant 0 : index
    %c0_0 = arith.constant 0 : index
    %c0_1 = arith.constant 0 : index
    %0 = vector.load %arg1[%c0, %c0_0, %c0_1] : memref<1x8x256xf32, #tpu.memory_space<vmem>>, vector<1x8x256xf32>
    %1 = vector.shape_cast %0 : vector<1x8x256xf32> to vector<8x256xf32>
    %c0_2 = arith.constant 0 : index
    %c0_3 = arith.constant 0 : index
    %2 = vector.load %arg4[%c0_2, %c0_3] : memref<112x16xf32, #tpu.memory_space<vmem>>, vector<112x16xf32>
    %3 = tpu.iota {dimensions = array<i32: 1>} : vector<1x256xi32>
    %c15_i32 = arith.constant 15 : i32
    %4 = vector.broadcast %c15_i32 : i32 to vector<1x256xi32>
    %5 = arith.andi %3, %4 : vector<1x256xi32>
    %c16_i32 = arith.constant 16 : i32
    %6 = vector.broadcast %c16_i32 : i32 to vector<1x256xi32>
    %7 = arith.cmpi sge, %3, %6 : vector<1x256xi32>
    %c1_i32 = arith.constant 1 : i32
    %8 = vector.broadcast %c1_i32 : i32 to vector<1x256xi32>
    %9 = arith.cmpi sge, %5, %8 : vector<1x256xi32>
    %10 = arith.andi %7, %9 : vector<1x256xi1>
    %c16_i32_4 = arith.constant 16 : i32
    %11 = vector.broadcast %c16_i32_4 : i32 to vector<1x256xi32>
    %12 = arith.cmpi sge, %3, %11 : vector<1x256xi32>
    %c16_i32_5 = arith.constant 16 : i32
    %13 = vector.broadcast %c16_i32_5 : i32 to vector<1x256xi32>
    %14 = arith.cmpi sge, %3, %13 : vector<1x256xi32>
    %c15_i32_6 = arith.constant 15 : i32
    %15 = vector.broadcast %c15_i32_6 : i32 to vector<1x256xi32>
    %16 = arith.cmpi slt, %5, %15 : vector<1x256xi32>
    %17 = arith.andi %14, %16 : vector<1x256xi1>
    %c1_i32_7 = arith.constant 1 : i32
    %18 = vector.broadcast %c1_i32_7 : i32 to vector<1x256xi32>
    %19 = arith.cmpi sge, %5, %18 : vector<1x256xi32>
    %c15_i32_8 = arith.constant 15 : i32
    %20 = vector.broadcast %c15_i32_8 : i32 to vector<1x256xi32>
    %21 = arith.cmpi slt, %5, %20 : vector<1x256xi32>
    %c240_i32 = arith.constant 240 : i32
    %22 = vector.broadcast %c240_i32 : i32 to vector<1x256xi32>
    %23 = arith.cmpi slt, %3, %22 : vector<1x256xi32>
    %c1_i32_9 = arith.constant 1 : i32
    %24 = vector.broadcast %c1_i32_9 : i32 to vector<1x256xi32>
    %25 = arith.cmpi sge, %5, %24 : vector<1x256xi32>
    %26 = arith.andi %23, %25 : vector<1x256xi1>
    %c240_i32_10 = arith.constant 240 : i32
    %27 = vector.broadcast %c240_i32_10 : i32 to vector<1x256xi32>
    %28 = arith.cmpi slt, %3, %27 : vector<1x256xi32>
    %c240_i32_11 = arith.constant 240 : i32
    %29 = vector.broadcast %c240_i32_11 : i32 to vector<1x256xi32>
    %30 = arith.cmpi slt, %3, %29 : vector<1x256xi32>
    %c15_i32_12 = arith.constant 15 : i32
    %31 = vector.broadcast %c15_i32_12 : i32 to vector<1x256xi32>
    %32 = arith.cmpi slt, %5, %31 : vector<1x256xi32>
    %33 = arith.andi %30, %32 : vector<1x256xi1>
    %c0_13 = arith.constant 0 : index
    %c0_14 = arith.constant 0 : index
    %34 = vector.load %arg2[%c0_13, %c0_14] : memref<16x72xf32, #tpu.memory_space<vmem>>, vector<16x72xf32>
    %c17_i32 = arith.constant 17 : i32
    %35 = tpu.dynamic_rotate %1 by %c17_i32 dim 1 : vector<8x256xf32>, i32 -> vector<8x256xf32>
    %cst = arith.constant 0.000000e+00 : f32
    %36 = vector.shape_cast %10 : vector<1x256xi1> to vector<1x256xi1>
    %37 = vector.broadcast %36 : vector<1x256xi1> to vector<8x256xi1>
    %38 = vector.broadcast %cst : f32 to vector<8x256xf32>
    %39 = arith.select %37, %35, %38 : vector<8x256xi1>, vector<8x256xf32>
    %c16_i32_15 = arith.constant 16 : i32
    %40 = tpu.dynamic_rotate %1 by %c16_i32_15 dim 1 : vector<8x256xf32>, i32 -> vector<8x256xf32>
    %cst_16 = arith.constant 0.000000e+00 : f32
    %41 = vector.shape_cast %12 : vector<1x256xi1> to vector<1x256xi1>
    %42 = vector.broadcast %41 : vector<1x256xi1> to vector<8x256xi1>
    %43 = vector.broadcast %cst_16 : f32 to vector<8x256xf32>
    %44 = arith.select %42, %40, %43 : vector<8x256xi1>, vector<8x256xf32>
    %c15_i32_17 = arith.constant 15 : i32
    %45 = tpu.dynamic_rotate %1 by %c15_i32_17 dim 1 : vector<8x256xf32>, i32 -> vector<8x256xf32>
    %cst_18 = arith.constant 0.000000e+00 : f32
    %46 = vector.shape_cast %17 : vector<1x256xi1> to vector<1x256xi1>
    %47 = vector.broadcast %46 : vector<1x256xi1> to vector<8x256xi1>
    %48 = vector.broadcast %cst_18 : f32 to vector<8x256xf32>
    %49 = arith.select %47, %45, %48 : vector<8x256xi1>, vector<8x256xf32>
    %c1_i32_19 = arith.constant 1 : i32
    %50 = tpu.dynamic_rotate %1 by %c1_i32_19 dim 1 : vector<8x256xf32>, i32 -> vector<8x256xf32>
    %cst_20 = arith.constant 0.000000e+00 : f32
    %51 = vector.shape_cast %19 : vector<1x256xi1> to vector<1x256xi1>
    %52 = vector.broadcast %51 : vector<1x256xi1> to vector<8x256xi1>
    %53 = vector.broadcast %cst_20 : f32 to vector<8x256xf32>
    %54 = arith.select %52, %50, %53 : vector<8x256xi1>, vector<8x256xf32>
    %c255_i32 = arith.constant 255 : i32
    %55 = tpu.dynamic_rotate %1 by %c255_i32 dim 1 : vector<8x256xf32>, i32 -> vector<8x256xf32>
    %cst_21 = arith.constant 0.000000e+00 : f32
    %56 = vector.shape_cast %21 : vector<1x256xi1> to vector<1x256xi1>
    %57 = vector.broadcast %56 : vector<1x256xi1> to vector<8x256xi1>
    %58 = vector.broadcast %cst_21 : f32 to vector<8x256xf32>
    %59 = arith.select %57, %55, %58 : vector<8x256xi1>, vector<8x256xf32>
    %c241_i32 = arith.constant 241 : i32
    %60 = tpu.dynamic_rotate %1 by %c241_i32 dim 1 : vector<8x256xf32>, i32 -> vector<8x256xf32>
    %cst_22 = arith.constant 0.000000e+00 : f32
    %61 = vector.shape_cast %26 : vector<1x256xi1> to vector<1x256xi1>
    %62 = vector.broadcast %61 : vector<1x256xi1> to vector<8x256xi1>
    %63 = vector.broadcast %cst_22 : f32 to vector<8x256xf32>
    %64 = arith.select %62, %60, %63 : vector<8x256xi1>, vector<8x256xf32>
    %c240_i32_23 = arith.constant 240 : i32
    %65 = tpu.dynamic_rotate %1 by %c240_i32_23 dim 1 : vector<8x256xf32>, i32 -> vector<8x256xf32>
    %cst_24 = arith.constant 0.000000e+00 : f32
    %66 = vector.shape_cast %28 : vector<1x256xi1> to vector<1x256xi1>
    %67 = vector.broadcast %66 : vector<1x256xi1> to vector<8x256xi1>
    %68 = vector.broadcast %cst_24 : f32 to vector<8x256xf32>
    %69 = arith.select %67, %65, %68 : vector<8x256xi1>, vector<8x256xf32>
    %c239_i32 = arith.constant 239 : i32
    %70 = tpu.dynamic_rotate %1 by %c239_i32 dim 1 : vector<8x256xf32>, i32 -> vector<8x256xf32>
    %cst_25 = arith.constant 0.000000e+00 : f32
    %71 = vector.shape_cast %33 : vector<1x256xi1> to vector<1x256xi1>
    %72 = vector.broadcast %71 : vector<1x256xi1> to vector<8x256xi1>
    %73 = vector.broadcast %cst_25 : f32 to vector<8x256xf32>
    %74 = arith.select %72, %70, %73 : vector<8x256xi1>, vector<8x256xf32>
    %75 = tpu.concatenate %39, %44, %49, %54, %1, %59, %64, %69, %74 in 0 : vector<8x256xf32>, vector<8x256xf32>, vector<8x256xf32>, vector<8x256xf32>, vector<8x256xf32>, vector<8x256xf32>, vector<8x256xf32>, vector<8x256xf32>, vector<8x256xf32> -> vector<72x256xf32>
    %cst_26 = arith.constant dense<0.000000e+00> : vector<16x256xf32>
    %76 = tpu.matmul %34, %75, %cst_26 {dimension_numbers = #tpu.dot_dimension_numbers<[1], [0], [0], [1], [0, 0, 1, 1], [], []>} : vector<16x72xf32>, vector<72x256xf32>, vector<16x256xf32> -> vector<16x256xf32>
    %c0_27 = arith.constant 0 : index
    %c0_28 = arith.constant 0 : index
    %c0_29 = arith.constant 0 : index
    %77 = vector.load %arg5[%c0_27, %c0_28, %c0_29] : memref<23x32x1xf32, #tpu.memory_space<vmem>>, vector<1x16x1xf32>
    %78 = vector.shape_cast %77 : vector<1x16x1xf32> to vector<16x1xf32>
    %79 = vector.broadcast %78 : vector<16x1xf32> to vector<16x256xf32>
    %80 = arith.addf %76, %79 : vector<16x256xf32>
    %c2 = arith.constant 2 : index
    %c0_30 = arith.constant 0 : index
    %c0_31 = arith.constant 0 : index
    %81 = vector.load %arg5[%c2, %c0_30, %c0_31] : memref<23x32x1xf32, #tpu.memory_space<vmem>>, vector<1x16x1xf32>
    %82 = vector.shape_cast %81 : vector<1x16x1xf32> to vector<16x1xf32>
    %c3 = arith.constant 3 : index
    %c0_32 = arith.constant 0 : index
    %c0_33 = arith.constant 0 : index
    %83 = vector.load %arg5[%c3, %c0_32, %c0_33] : memref<23x32x1xf32, #tpu.memory_space<vmem>>, vector<1x16x1xf32>
    %84 = vector.shape_cast %83 : vector<1x16x1xf32> to vector<16x1xf32>
    %cst_34 = arith.constant dense<0.000000e+00> : vector<256xf32>
    %85 = vector.multi_reduction <add>, %80, %cst_34 [0] : vector<16x256xf32> to vector<256xf32>
    %86 = vector.shape_cast %85 : vector<256xf32> to vector<1x256xf32>
    %cst_35 = arith.constant 1.600000e+01 : f32
    %87 = vector.broadcast %cst_35 : f32 to vector<1x256xf32>
    %88 = arith.divf %86, %87 : vector<1x256xf32>
    %89 = vector.broadcast %88 : vector<1x256xf32> to vector<16x256xf32>
    %90 = arith.subf %80, %89 : vector<16x256xf32>
    %91 = arith.mulf %90, %90 : vector<16x256xf32>
    %cst_36 = arith.constant dense<0.000000e+00> : vector<256xf32>
    %92 = vector.multi_reduction <add>, %91, %cst_36 [0] : vector<16x256xf32> to vector<256xf32>
    %93 = vector.shape_cast %92 : vector<256xf32> to vector<1x256xf32>
    %cst_37 = arith.constant 1.600000e+01 : f32
    %94 = vector.broadcast %cst_37 : f32 to vector<1x256xf32>
    %95 = arith.divf %93, %94 : vector<1x256xf32>
    %96 = vector.broadcast %88 : vector<1x256xf32> to vector<16x256xf32>
    %97 = arith.subf %80, %96 : vector<16x256xf32>
    %cst_38 = arith.constant 9.99999997E-7 : f32
    %98 = vector.broadcast %cst_38 : f32 to vector<1x256xf32>
    %99 = arith.addf %95, %98 : vector<1x256xf32>
    %100 = math.rsqrt %99 : vector<1x256xf32>
    %101 = vector.broadcast %100 : vector<1x256xf32> to vector<16x256xf32>
    %102 = arith.mulf %97, %101 : vector<16x256xf32>
    %103 = vector.broadcast %82 : vector<16x1xf32> to vector<16x256xf32>
    %104 = arith.mulf %102, %103 : vector<16x256xf32>
    %105 = vector.broadcast %84 : vector<16x1xf32> to vector<16x256xf32>
    %106 = arith.addf %104, %105 : vector<16x256xf32>
    %107 = vector.extract_strided_slice %2 {offsets = [0, 0], sizes = [32, 16], strides = [1, 1]} : vector<112x16xf32> to vector<32x16xf32>
    %cst_39 = arith.constant dense<0.000000e+00> : vector<32x256xf32>
    %108 = tpu.matmul %107, %106, %cst_39 {dimension_numbers = #tpu.dot_dimension_numbers<[1], [0], [0], [1], [0, 0, 1, 1], [], []>} : vector<32x16xf32>, vector<16x256xf32>, vector<32x256xf32> -> vector<32x256xf32>
    %c4 = arith.constant 4 : index
    %c0_40 = arith.constant 0 : index
    %c0_41 = arith.constant 0 : index
    %109 = vector.load %arg5[%c4, %c0_40, %c0_41] : memref<23x32x1xf32, #tpu.memory_space<vmem>>, vector<1x32x1xf32>
    %110 = vector.shape_cast %109 : vector<1x32x1xf32> to vector<32x1xf32>
    %111 = vector.broadcast %110 : vector<32x1xf32> to vector<32x256xf32>
    %112 = arith.addf %108, %111 : vector<32x256xf32>
    %c17_i32_42 = arith.constant 17 : i32
    %113 = tpu.dynamic_rotate %112 by %c17_i32_42 dim 1 : vector<32x256xf32>, i32 -> vector<32x256xf32>
    %cst_43 = arith.constant 0.000000e+00 : f32
    %114 = vector.shape_cast %10 : vector<1x256xi1> to vector<1x256xi1>
    %115 = vector.broadcast %114 : vector<1x256xi1> to vector<32x256xi1>
    %116 = vector.broadcast %cst_43 : f32 to vector<32x256xf32>
    %117 = arith.select %115, %113, %116 : vector<32x256xi1>, vector<32x256xf32>
    %c14 = arith.constant 14 : index
    %c0_44 = arith.constant 0 : index
    %c0_45 = arith.constant 0 : index
    %118 = vector.load %arg5[%c14, %c0_44, %c0_45] : memref<23x32x1xf32, #tpu.memory_space<vmem>>, vector<1x32x1xf32>
    %119 = vector.shape_cast %118 : vector<1x32x1xf32> to vector<32x1xf32>
    %120 = vector.broadcast %119 : vector<32x1xf32> to vector<32x256xf32>
    %121 = arith.mulf %117, %120 : vector<32x256xf32>
    %c16_i32_46 = arith.constant 16 : i32
    %122 = tpu.dynamic_rotate %112 by %c16_i32_46 dim 1 : vector<32x256xf32>, i32 -> vector<32x256xf32>
    %cst_47 = arith.constant 0.000000e+00 : f32
    %123 = vector.shape_cast %12 : vector<1x256xi1> to vector<1x256xi1>
    %124 = vector.broadcast %123 : vector<1x256xi1> to vector<32x256xi1>
    %125 = vector.broadcast %cst_47 : f32 to vector<32x256xf32>
    %126 = arith.select %124, %122, %125 : vector<32x256xi1>, vector<32x256xf32>
    %c15 = arith.constant 15 : index
    %c0_48 = arith.constant 0 : index
    %c0_49 = arith.constant 0 : index
    %127 = vector.load %arg5[%c15, %c0_48, %c0_49] : memref<23x32x1xf32, #tpu.memory_space<vmem>>, vector<1x32x1xf32>
    %128 = vector.shape_cast %127 : vector<1x32x1xf32> to vector<32x1xf32>
    %129 = vector.broadcast %128 : vector<32x1xf32> to vector<32x256xf32>
    %130 = arith.mulf %126, %129 : vector<32x256xf32>
    %131 = arith.addf %121, %130 : vector<32x256xf32>
    %c15_i32_50 = arith.constant 15 : i32
    %132 = tpu.dynamic_rotate %112 by %c15_i32_50 dim 1 : vector<32x256xf32>, i32 -> vector<32x256xf32>
    %cst_51 = arith.constant 0.000000e+00 : f32
    %133 = vector.shape_cast %17 : vector<1x256xi1> to vector<1x256xi1>
    %134 = vector.broadcast %133 : vector<1x256xi1> to vector<32x256xi1>
    %135 = vector.broadcast %cst_51 : f32 to vector<32x256xf32>
    %136 = arith.select %134, %132, %135 : vector<32x256xi1>, vector<32x256xf32>
    %c16 = arith.constant 16 : index
    %c0_52 = arith.constant 0 : index
    %c0_53 = arith.constant 0 : index
    %137 = vector.load %arg5[%c16, %c0_52, %c0_53] : memref<23x32x1xf32, #tpu.memory_space<vmem>>, vector<1x32x1xf32>
    %138 = vector.shape_cast %137 : vector<1x32x1xf32> to vector<32x1xf32>
    %139 = vector.broadcast %138 : vector<32x1xf32> to vector<32x256xf32>
    %140 = arith.mulf %136, %139 : vector<32x256xf32>
    %141 = arith.addf %131, %140 : vector<32x256xf32>
    %c1_i32_54 = arith.constant 1 : i32
    %142 = tpu.dynamic_rotate %112 by %c1_i32_54 dim 1 : vector<32x256xf32>, i32 -> vector<32x256xf32>
    %cst_55 = arith.constant 0.000000e+00 : f32
    %143 = vector.shape_cast %19 : vector<1x256xi1> to vector<1x256xi1>
    %144 = vector.broadcast %143 : vector<1x256xi1> to vector<32x256xi1>
    %145 = vector.broadcast %cst_55 : f32 to vector<32x256xf32>
    %146 = arith.select %144, %142, %145 : vector<32x256xi1>, vector<32x256xf32>
    %c17 = arith.constant 17 : index
    %c0_56 = arith.constant 0 : index
    %c0_57 = arith.constant 0 : index
    %147 = vector.load %arg5[%c17, %c0_56, %c0_57] : memref<23x32x1xf32, #tpu.memory_space<vmem>>, vector<1x32x1xf32>
    %148 = vector.shape_cast %147 : vector<1x32x1xf32> to vector<32x1xf32>
    %149 = vector.broadcast %148 : vector<32x1xf32> to vector<32x256xf32>
    %150 = arith.mulf %146, %149 : vector<32x256xf32>
    %151 = arith.addf %141, %150 : vector<32x256xf32>
    %c18 = arith.constant 18 : index
    %c0_58 = arith.constant 0 : index
    %c0_59 = arith.constant 0 : index
    %152 = vector.load %arg5[%c18, %c0_58, %c0_59] : memref<23x32x1xf32, #tpu.memory_space<vmem>>, vector<1x32x1xf32>
    %153 = vector.shape_cast %152 : vector<1x32x1xf32> to vector<32x1xf32>
    %154 = vector.broadcast %153 : vector<32x1xf32> to vector<32x256xf32>
    %155 = arith.mulf %112, %154 : vector<32x256xf32>
    %156 = arith.addf %151, %155 : vector<32x256xf32>
    %c255_i32_60 = arith.constant 255 : i32
    %157 = tpu.dynamic_rotate %112 by %c255_i32_60 dim 1 : vector<32x256xf32>, i32 -> vector<32x256xf32>
    %cst_61 = arith.constant 0.000000e+00 : f32
    %158 = vector.shape_cast %21 : vector<1x256xi1> to vector<1x256xi1>
    %159 = vector.broadcast %158 : vector<1x256xi1> to vector<32x256xi1>
    %160 = vector.broadcast %cst_61 : f32 to vector<32x256xf32>
    %161 = arith.select %159, %157, %160 : vector<32x256xi1>, vector<32x256xf32>
    %c19 = arith.constant 19 : index
    %c0_62 = arith.constant 0 : index
    %c0_63 = arith.constant 0 : index
    %162 = vector.load %arg5[%c19, %c0_62, %c0_63] : memref<23x32x1xf32, #tpu.memory_space<vmem>>, vector<1x32x1xf32>
    %163 = vector.shape_cast %162 : vector<1x32x1xf32> to vector<32x1xf32>
    %164 = vector.broadcast %163 : vector<32x1xf32> to vector<32x256xf32>
    %165 = arith.mulf %161, %164 : vector<32x256xf32>
    %166 = arith.addf %156, %165 : vector<32x256xf32>
    %c241_i32_64 = arith.constant 241 : i32
    %167 = tpu.dynamic_rotate %112 by %c241_i32_64 dim 1 : vector<32x256xf32>, i32 -> vector<32x256xf32>
    %cst_65 = arith.constant 0.000000e+00 : f32
    %168 = vector.shape_cast %26 : vector<1x256xi1> to vector<1x256xi1>
    %169 = vector.broadcast %168 : vector<1x256xi1> to vector<32x256xi1>
    %170 = vector.broadcast %cst_65 : f32 to vector<32x256xf32>
    %171 = arith.select %169, %167, %170 : vector<32x256xi1>, vector<32x256xf32>
    %c20 = arith.constant 20 : index
    %c0_66 = arith.constant 0 : index
    %c0_67 = arith.constant 0 : index
    %172 = vector.load %arg5[%c20, %c0_66, %c0_67] : memref<23x32x1xf32, #tpu.memory_space<vmem>>, vector<1x32x1xf32>
    %173 = vector.shape_cast %172 : vector<1x32x1xf32> to vector<32x1xf32>
    %174 = vector.broadcast %173 : vector<32x1xf32> to vector<32x256xf32>
    %175 = arith.mulf %171, %174 : vector<32x256xf32>
    %176 = arith.addf %166, %175 : vector<32x256xf32>
    %c240_i32_68 = arith.constant 240 : i32
    %177 = tpu.dynamic_rotate %112 by %c240_i32_68 dim 1 : vector<32x256xf32>, i32 -> vector<32x256xf32>
    %cst_69 = arith.constant 0.000000e+00 : f32
    %178 = vector.shape_cast %28 : vector<1x256xi1> to vector<1x256xi1>
    %179 = vector.broadcast %178 : vector<1x256xi1> to vector<32x256xi1>
    %180 = vector.broadcast %cst_69 : f32 to vector<32x256xf32>
    %181 = arith.select %179, %177, %180 : vector<32x256xi1>, vector<32x256xf32>
    %c21 = arith.constant 21 : index
    %c0_70 = arith.constant 0 : index
    %c0_71 = arith.constant 0 : index
    %182 = vector.load %arg5[%c21, %c0_70, %c0_71] : memref<23x32x1xf32, #tpu.memory_space<vmem>>, vector<1x32x1xf32>
    %183 = vector.shape_cast %182 : vector<1x32x1xf32> to vector<32x1xf32>
    %184 = vector.broadcast %183 : vector<32x1xf32> to vector<32x256xf32>
    %185 = arith.mulf %181, %184 : vector<32x256xf32>
    %186 = arith.addf %176, %185 : vector<32x256xf32>
    %c239_i32_72 = arith.constant 239 : i32
    %187 = tpu.dynamic_rotate %112 by %c239_i32_72 dim 1 : vector<32x256xf32>, i32 -> vector<32x256xf32>
    %cst_73 = arith.constant 0.000000e+00 : f32
    %188 = vector.shape_cast %33 : vector<1x256xi1> to vector<1x256xi1>
    %189 = vector.broadcast %188 : vector<1x256xi1> to vector<32x256xi1>
    %190 = vector.broadcast %cst_73 : f32 to vector<32x256xf32>
    %191 = arith.select %189, %187, %190 : vector<32x256xi1>, vector<32x256xf32>
    %c22 = arith.constant 22 : index
    %c0_74 = arith.constant 0 : index
    %c0_75 = arith.constant 0 : index
    %192 = vector.load %arg5[%c22, %c0_74, %c0_75] : memref<23x32x1xf32, #tpu.memory_space<vmem>>, vector<1x32x1xf32>
    %193 = vector.shape_cast %192 : vector<1x32x1xf32> to vector<32x1xf32>
    %194 = vector.broadcast %193 : vector<32x1xf32> to vector<32x256xf32>
    %195 = arith.mulf %191, %194 : vector<32x256xf32>
    %196 = arith.addf %186, %195 : vector<32x256xf32>
    %c5 = arith.constant 5 : index
    %c0_76 = arith.constant 0 : index
    %c0_77 = arith.constant 0 : index
    %197 = vector.load %arg5[%c5, %c0_76, %c0_77] : memref<23x32x1xf32, #tpu.memory_space<vmem>>, vector<1x32x1xf32>
    %198 = vector.shape_cast %197 : vector<1x32x1xf32> to vector<32x1xf32>
    %199 = vector.broadcast %198 : vector<32x1xf32> to vector<32x256xf32>
    %200 = arith.addf %196, %199 : vector<32x256xf32>
    %201 = vector.extract_strided_slice %200 {offsets = [0, 0], sizes = [16, 256], strides = [1, 1]} : vector<32x256xf32> to vector<16x256xf32>
    %202 = vector.extract_strided_slice %200 {offsets = [16, 0], sizes = [16, 256], strides = [1, 1]} : vector<32x256xf32> to vector<16x256xf32>
    %203 = arith.mulf %201, %202 : vector<16x256xf32>
    %204 = vector.extract_strided_slice %2 {offsets = [32, 0], sizes = [16, 16], strides = [1, 1]} : vector<112x16xf32> to vector<16x16xf32>
    %cst_78 = arith.constant dense<0.000000e+00> : vector<16x256xf32>
    %205 = tpu.matmul %204, %203, %cst_78 {dimension_numbers = #tpu.dot_dimension_numbers<[1], [0], [0], [1], [0, 0, 1, 1], [], []>} : vector<16x16xf32>, vector<16x256xf32>, vector<16x256xf32> -> vector<16x256xf32>
    %cst_79 = arith.constant dense<0.000000e+00> : vector<16xf32>
    %206 = vector.multi_reduction <add>, %205, %cst_79 [1] : vector<16x256xf32> to vector<16xf32>
    %207 = vector.shape_cast %206 : vector<16xf32> to vector<16x1xf32>
    %cst_80 = arith.constant 2.560000e+02 : f32
    %208 = vector.broadcast %cst_80 : f32 to vector<16x1xf32>
    %209 = arith.divf %207, %208 : vector<16x1xf32>
    %c6 = arith.constant 6 : index
    %c0_81 = arith.constant 0 : index
    %c0_82 = arith.constant 0 : index
    %210 = vector.load %arg5[%c6, %c0_81, %c0_82] : memref<23x32x1xf32, #tpu.memory_space<vmem>>, vector<1x16x1xf32>
    %211 = vector.shape_cast %210 : vector<1x16x1xf32> to vector<16x1xf32>
    %212 = arith.addf %209, %211 : vector<16x1xf32>
    %213 = vector.broadcast %212 : vector<16x1xf32> to vector<16x256xf32>
    %214 = arith.mulf %203, %213 : vector<16x256xf32>
    %215 = vector.extract_strided_slice %2 {offsets = [48, 0], sizes = [16, 16], strides = [1, 1]} : vector<112x16xf32> to vector<16x16xf32>
    %cst_83 = arith.constant dense<0.000000e+00> : vector<16x256xf32>
    %216 = tpu.matmul %215, %214, %cst_83 {dimension_numbers = #tpu.dot_dimension_numbers<[1], [0], [0], [1], [0, 0, 1, 1], [], []>} : vector<16x16xf32>, vector<16x256xf32>, vector<16x256xf32> -> vector<16x256xf32>
    %c7 = arith.constant 7 : index
    %c0_84 = arith.constant 0 : index
    %c0_85 = arith.constant 0 : index
    %217 = vector.load %arg5[%c7, %c0_84, %c0_85] : memref<23x32x1xf32, #tpu.memory_space<vmem>>, vector<1x16x1xf32>
    %218 = vector.shape_cast %217 : vector<1x16x1xf32> to vector<16x1xf32>
    %219 = vector.broadcast %218 : vector<16x1xf32> to vector<16x256xf32>
    %220 = arith.addf %216, %219 : vector<16x256xf32>
    %c8 = arith.constant 8 : index
    %c0_86 = arith.constant 0 : index
    %c0_87 = arith.constant 0 : index
    %221 = vector.load %arg5[%c8, %c0_86, %c0_87] : memref<23x32x1xf32, #tpu.memory_space<vmem>>, vector<1x16x1xf32>
    %222 = vector.shape_cast %221 : vector<1x16x1xf32> to vector<16x1xf32>
    %223 = vector.broadcast %222 : vector<16x1xf32> to vector<16x256xf32>
    %224 = arith.mulf %220, %223 : vector<16x256xf32>
    %225 = arith.addf %80, %224 : vector<16x256xf32>
    %c9 = arith.constant 9 : index
    %c0_88 = arith.constant 0 : index
    %c0_89 = arith.constant 0 : index
    %226 = vector.load %arg5[%c9, %c0_88, %c0_89] : memref<23x32x1xf32, #tpu.memory_space<vmem>>, vector<1x16x1xf32>
    %227 = vector.shape_cast %226 : vector<1x16x1xf32> to vector<16x1xf32>
    %c10 = arith.constant 10 : index
    %c0_90 = arith.constant 0 : index
    %c0_91 = arith.constant 0 : index
    %228 = vector.load %arg5[%c10, %c0_90, %c0_91] : memref<23x32x1xf32, #tpu.memory_space<vmem>>, vector<1x16x1xf32>
    %229 = vector.shape_cast %228 : vector<1x16x1xf32> to vector<16x1xf32>
    %cst_92 = arith.constant dense<0.000000e+00> : vector<256xf32>
    %230 = vector.multi_reduction <add>, %225, %cst_92 [0] : vector<16x256xf32> to vector<256xf32>
    %231 = vector.shape_cast %230 : vector<256xf32> to vector<1x256xf32>
    %cst_93 = arith.constant 1.600000e+01 : f32
    %232 = vector.broadcast %cst_93 : f32 to vector<1x256xf32>
    %233 = arith.divf %231, %232 : vector<1x256xf32>
    %234 = vector.broadcast %233 : vector<1x256xf32> to vector<16x256xf32>
    %235 = arith.subf %225, %234 : vector<16x256xf32>
    %236 = arith.mulf %235, %235 : vector<16x256xf32>
    %cst_94 = arith.constant dense<0.000000e+00> : vector<256xf32>
    %237 = vector.multi_reduction <add>, %236, %cst_94 [0] : vector<16x256xf32> to vector<256xf32>
    %238 = vector.shape_cast %237 : vector<256xf32> to vector<1x256xf32>
    %cst_95 = arith.constant 1.600000e+01 : f32
    %239 = vector.broadcast %cst_95 : f32 to vector<1x256xf32>
    %240 = arith.divf %238, %239 : vector<1x256xf32>
    %241 = vector.broadcast %233 : vector<1x256xf32> to vector<16x256xf32>
    %242 = arith.subf %225, %241 : vector<16x256xf32>
    %cst_96 = arith.constant 9.99999997E-7 : f32
    %243 = vector.broadcast %cst_96 : f32 to vector<1x256xf32>
    %244 = arith.addf %240, %243 : vector<1x256xf32>
    %245 = math.rsqrt %244 : vector<1x256xf32>
    %246 = vector.broadcast %245 : vector<1x256xf32> to vector<16x256xf32>
    %247 = arith.mulf %242, %246 : vector<16x256xf32>
    %248 = vector.broadcast %227 : vector<16x1xf32> to vector<16x256xf32>
    %249 = arith.mulf %247, %248 : vector<16x256xf32>
    %250 = vector.broadcast %229 : vector<16x1xf32> to vector<16x256xf32>
    %251 = arith.addf %249, %250 : vector<16x256xf32>
    %252 = vector.extract_strided_slice %2 {offsets = [64, 0], sizes = [32, 16], strides = [1, 1]} : vector<112x16xf32> to vector<32x16xf32>
    %cst_97 = arith.constant dense<0.000000e+00> : vector<32x256xf32>
    %253 = tpu.matmul %252, %251, %cst_97 {dimension_numbers = #tpu.dot_dimension_numbers<[1], [0], [0], [1], [0, 0, 1, 1], [], []>} : vector<32x16xf32>, vector<16x256xf32>, vector<32x256xf32> -> vector<32x256xf32>
    %c11 = arith.constant 11 : index
    %c0_98 = arith.constant 0 : index
    %c0_99 = arith.constant 0 : index
    %254 = vector.load %arg5[%c11, %c0_98, %c0_99] : memref<23x32x1xf32, #tpu.memory_space<vmem>>, vector<1x32x1xf32>
    %255 = vector.shape_cast %254 : vector<1x32x1xf32> to vector<32x1xf32>
    %256 = vector.broadcast %255 : vector<32x1xf32> to vector<32x256xf32>
    %257 = arith.addf %253, %256 : vector<32x256xf32>
    %258 = vector.extract_strided_slice %257 {offsets = [0, 0], sizes = [16, 256], strides = [1, 1]} : vector<32x256xf32> to vector<16x256xf32>
    %259 = vector.extract_strided_slice %257 {offsets = [16, 0], sizes = [16, 256], strides = [1, 1]} : vector<32x256xf32> to vector<16x256xf32>
    %260 = arith.mulf %258, %259 : vector<16x256xf32>
    %261 = vector.extract_strided_slice %2 {offsets = [96, 0], sizes = [16, 16], strides = [1, 1]} : vector<112x16xf32> to vector<16x16xf32>
    %cst_100 = arith.constant dense<0.000000e+00> : vector<16x256xf32>
    %262 = tpu.matmul %261, %260, %cst_100 {dimension_numbers = #tpu.dot_dimension_numbers<[1], [0], [0], [1], [0, 0, 1, 1], [], []>} : vector<16x16xf32>, vector<16x256xf32>, vector<16x256xf32> -> vector<16x256xf32>
    %c12 = arith.constant 12 : index
    %c0_101 = arith.constant 0 : index
    %c0_102 = arith.constant 0 : index
    %263 = vector.load %arg5[%c12, %c0_101, %c0_102] : memref<23x32x1xf32, #tpu.memory_space<vmem>>, vector<1x16x1xf32>
    %264 = vector.shape_cast %263 : vector<1x16x1xf32> to vector<16x1xf32>
    %265 = vector.broadcast %264 : vector<16x1xf32> to vector<16x256xf32>
    %266 = arith.addf %262, %265 : vector<16x256xf32>
    %c13 = arith.constant 13 : index
    %c0_103 = arith.constant 0 : index
    %c0_104 = arith.constant 0 : index
    %267 = vector.load %arg5[%c13, %c0_103, %c0_104] : memref<23x32x1xf32, #tpu.memory_space<vmem>>, vector<1x16x1xf32>
    %268 = vector.shape_cast %267 : vector<1x16x1xf32> to vector<16x1xf32>
    %269 = vector.broadcast %268 : vector<16x1xf32> to vector<16x256xf32>
    %270 = arith.mulf %266, %269 : vector<16x256xf32>
    %271 = arith.addf %225, %270 : vector<16x256xf32>
    %c0_105 = arith.constant 0 : index
    %c0_106 = arith.constant 0 : index
    %272 = vector.load %arg3[%c0_105, %c0_106] : memref<3x144xf32, #tpu.memory_space<vmem>>, vector<3x144xf32>
    %c17_i32_107 = arith.constant 17 : i32
    %273 = tpu.dynamic_rotate %271 by %c17_i32_107 dim 1 : vector<16x256xf32>, i32 -> vector<16x256xf32>
    %cst_108 = arith.constant 0.000000e+00 : f32
    %274 = vector.shape_cast %10 : vector<1x256xi1> to vector<1x256xi1>
    %275 = vector.broadcast %274 : vector<1x256xi1> to vector<16x256xi1>
    %276 = vector.broadcast %cst_108 : f32 to vector<16x256xf32>
    %277 = arith.select %275, %273, %276 : vector<16x256xi1>, vector<16x256xf32>
    %c16_i32_109 = arith.constant 16 : i32
    %278 = tpu.dynamic_rotate %271 by %c16_i32_109 dim 1 : vector<16x256xf32>, i32 -> vector<16x256xf32>
    %cst_110 = arith.constant 0.000000e+00 : f32
    %279 = vector.shape_cast %12 : vector<1x256xi1> to vector<1x256xi1>
    %280 = vector.broadcast %279 : vector<1x256xi1> to vector<16x256xi1>
    %281 = vector.broadcast %cst_110 : f32 to vector<16x256xf32>
    %282 = arith.select %280, %278, %281 : vector<16x256xi1>, vector<16x256xf32>
    %c15_i32_111 = arith.constant 15 : i32
    %283 = tpu.dynamic_rotate %271 by %c15_i32_111 dim 1 : vector<16x256xf32>, i32 -> vector<16x256xf32>
    %cst_112 = arith.constant 0.000000e+00 : f32
    %284 = vector.shape_cast %17 : vector<1x256xi1> to vector<1x256xi1>
    %285 = vector.broadcast %284 : vector<1x256xi1> to vector<16x256xi1>
    %286 = vector.broadcast %cst_112 : f32 to vector<16x256xf32>
    %287 = arith.select %285, %283, %286 : vector<16x256xi1>, vector<16x256xf32>
    %c1_i32_113 = arith.constant 1 : i32
    %288 = tpu.dynamic_rotate %271 by %c1_i32_113 dim 1 : vector<16x256xf32>, i32 -> vector<16x256xf32>
    %cst_114 = arith.constant 0.000000e+00 : f32
    %289 = vector.shape_cast %19 : vector<1x256xi1> to vector<1x256xi1>
    %290 = vector.broadcast %289 : vector<1x256xi1> to vector<16x256xi1>
    %291 = vector.broadcast %cst_114 : f32 to vector<16x256xf32>
    %292 = arith.select %290, %288, %291 : vector<16x256xi1>, vector<16x256xf32>
    %c255_i32_115 = arith.constant 255 : i32
    %293 = tpu.dynamic_rotate %271 by %c255_i32_115 dim 1 : vector<16x256xf32>, i32 -> vector<16x256xf32>
    %cst_116 = arith.constant 0.000000e+00 : f32
    %294 = vector.shape_cast %21 : vector<1x256xi1> to vector<1x256xi1>
    %295 = vector.broadcast %294 : vector<1x256xi1> to vector<16x256xi1>
    %296 = vector.broadcast %cst_116 : f32 to vector<16x256xf32>
    %297 = arith.select %295, %293, %296 : vector<16x256xi1>, vector<16x256xf32>
    %c241_i32_117 = arith.constant 241 : i32
    %298 = tpu.dynamic_rotate %271 by %c241_i32_117 dim 1 : vector<16x256xf32>, i32 -> vector<16x256xf32>
    %cst_118 = arith.constant 0.000000e+00 : f32
    %299 = vector.shape_cast %26 : vector<1x256xi1> to vector<1x256xi1>
    %300 = vector.broadcast %299 : vector<1x256xi1> to vector<16x256xi1>
    %301 = vector.broadcast %cst_118 : f32 to vector<16x256xf32>
    %302 = arith.select %300, %298, %301 : vector<16x256xi1>, vector<16x256xf32>
    %c240_i32_119 = arith.constant 240 : i32
    %303 = tpu.dynamic_rotate %271 by %c240_i32_119 dim 1 : vector<16x256xf32>, i32 -> vector<16x256xf32>
    %cst_120 = arith.constant 0.000000e+00 : f32
    %304 = vector.shape_cast %28 : vector<1x256xi1> to vector<1x256xi1>
    %305 = vector.broadcast %304 : vector<1x256xi1> to vector<16x256xi1>
    %306 = vector.broadcast %cst_120 : f32 to vector<16x256xf32>
    %307 = arith.select %305, %303, %306 : vector<16x256xi1>, vector<16x256xf32>
    %c239_i32_121 = arith.constant 239 : i32
    %308 = tpu.dynamic_rotate %271 by %c239_i32_121 dim 1 : vector<16x256xf32>, i32 -> vector<16x256xf32>
    %cst_122 = arith.constant 0.000000e+00 : f32
    %309 = vector.shape_cast %33 : vector<1x256xi1> to vector<1x256xi1>
    %310 = vector.broadcast %309 : vector<1x256xi1> to vector<16x256xi1>
    %311 = vector.broadcast %cst_122 : f32 to vector<16x256xf32>
    %312 = arith.select %310, %308, %311 : vector<16x256xi1>, vector<16x256xf32>
    %313 = tpu.concatenate %277, %282, %287, %292, %271, %297, %302, %307, %312 in 0 : vector<16x256xf32>, vector<16x256xf32>, vector<16x256xf32>, vector<16x256xf32>, vector<16x256xf32>, vector<16x256xf32>, vector<16x256xf32>, vector<16x256xf32>, vector<16x256xf32> -> vector<144x256xf32>
    %cst_123 = arith.constant dense<0.000000e+00> : vector<3x256xf32>
    %314 = tpu.matmul %272, %313, %cst_123 {dimension_numbers = #tpu.dot_dimension_numbers<[1], [0], [0], [1], [0, 0, 1, 1], [], []>} : vector<3x144xf32>, vector<144x256xf32>, vector<3x256xf32> -> vector<3x256xf32>
    %c1 = arith.constant 1 : index
    %c0_124 = arith.constant 0 : index
    %c0_125 = arith.constant 0 : index
    %315 = vector.load %arg5[%c1, %c0_124, %c0_125] : memref<23x32x1xf32, #tpu.memory_space<vmem>>, vector<1x3x1xf32>
    %316 = vector.shape_cast %315 : vector<1x3x1xf32> to vector<3x1xf32>
    %317 = vector.broadcast %316 : vector<3x1xf32> to vector<3x256xf32>
    %318 = arith.addf %314, %317 : vector<3x256xf32>
    %319 = vector.extract_strided_slice %1 {offsets = [0, 0], sizes = [3, 256], strides = [1, 1]} : vector<8x256xf32> to vector<3x256xf32>
    %320 = arith.addf %318, %319 : vector<3x256xf32>
    %c0_126 = arith.constant 0 : index
    %c0_127 = arith.constant 0 : index
    %c0_128 = arith.constant 0 : index
    %321 = vector.load %arg6[%c0_126, %c0_127, %c0_128] : memref<1x3x256xf32, #tpu.memory_space<vmem>>, vector<1x3x256xf32>
    %322 = vector.shape_cast %321 : vector<1x3x256xf32> to vector<3x256xf32>
    %323 = vector.shape_cast %320 : vector<3x256xf32> to vector<1x3x256xf32>
    tpu.vector_store %arg6[%c0_126, %c0_127, %c0_128], %323 {strides = array<i32>} : memref<1x3x256xf32, #tpu.memory_space<vmem>>, vector<1x3x256xf32>,
    return
  }
  func.func @transform_0(%arg0: i32) -> (i32, i32, i32) {
    %c0_i32 = arith.constant 0 : i32
    %c0_i32_0 = arith.constant 0 : i32
    %c0_i32_1 = arith.constant 0 : i32
    return %arg0, %c0_i32, %c0_i32_0 : i32, i32, i32
  }
  func.func @transform_1(%arg0: i32) -> (i32, i32) {
    %c0_i32 = arith.constant 0 : i32
    %c0_i32_0 = arith.constant 0 : i32
    %c0_i32_1 = arith.constant 0 : i32
    return %c0_i32, %c0_i32_0 : i32, i32
  }
  func.func @transform_2(%arg0: i32) -> (i32, i32) {
    %c0_i32 = arith.constant 0 : i32
    %c0_i32_0 = arith.constant 0 : i32
    %c0_i32_1 = arith.constant 0 : i32
    return %c0_i32, %c0_i32_0 : i32, i32
  }
  func.func @transform_3(%arg0: i32) -> (i32, i32) {
    %c0_i32 = arith.constant 0 : i32
    %c0_i32_0 = arith.constant 0 : i32
    %c0_i32_1 = arith.constant 0 : i32
    return %c0_i32, %c0_i32_0 : i32, i32
  }
  func.func @transform_4(%arg0: i32) -> (i32, i32, i32) {
    %c0_i32 = arith.constant 0 : i32
    %c0_i32_0 = arith.constant 0 : i32
    %c0_i32_1 = arith.constant 0 : i32
    %c0_i32_2 = arith.constant 0 : i32
    return %c0_i32, %c0_i32_0, %c0_i32_1 : i32, i32, i32
  }
  func.func @transform_5(%arg0: i32) -> (i32, i32, i32) {
    %c0_i32 = arith.constant 0 : i32
    %c0_i32_0 = arith.constant 0 : i32
    %c0_i32_1 = arith.constant 0 : i32
    return %arg0, %c0_i32, %c0_i32_0 : i32, i32, i32
  }
}

</mosaic_0001>

<bundles_post_ra>
// kernel: tpu_custom_call.1
= control target key start
LH: loop header
LB: loop body
LE: loop exit
PB: predicated region body
PF: predicated region fallthrough
CT: control target
= control target key end

     0   :  { %s2279_s18 = smov 0   ;;  %s3685_s0 = inlined_call_operand.vmem [shape: f32[2,8,256], index: 0, kind: input, shape index: {}]   ;;  %s3686_s1 = inlined_call_operand.vmem [shape: f32[16,72], index: 1, kind: input, shape index: {}]   ;;  %s3687_s2 = inlined_call_operand.vmem [shape: f32[3,144], index: 2, kind: input, shape index: {}]   ;;  %s3688_s3 = inlined_call_operand.vmem [shape: f32[112,16], index: 3, kind: input, shape index: {}]   ;;  %s3689_s4 = inlined_call_operand.vmem [shape: f32[23,32,1], index: 4, kind: input, shape index: {}]   ;;  %s3690_s5 = inlined_call_operand.vmem [shape: f32[2,3,256], index: 5, kind: output, shape index: {}]  }
   0x1 LB: > { %s2034_s19 = sadd.s32 4294967295, %s2236_s18   ;;  %p2038_p0 = scmp.ge.s32.totalorder %s2236_s18, 1  ;;  %s2236_s18 = sphi %s2279_s18, %s15_s18  }
   0x2   : > { %p187_p1 = scmp.lt.s32.totalorder %s2236_s18, 3 }
   0x4   : > { %p188_p2 = pnand %p2038_p0, %p187_p1 }
   0x6   : > { %191 = sbr.rel (%p188_p2) target bundleno = 2053 (0x805), region = 40 }
   0xb   : > { %p215_p3 = scmp.lt.s32.totalorder %s2034_s19, 1  ;;  %s2238_s24 = smov 112   ;;  %v2241_v2 = vmov 0   ;;  %v368_v3 = vld [vmem:[%s3689_s4] sm:$0xff]  ;;  %v2062_v5 = vld [vmem:[%s3689_s4 + $0x48] sm:$0xff]  ;;  %v2068_v7 = vld [vmem:[%s3689_s4 + $0x98] sm:$0xff]  ;;  %v241_v18 = vlaneseq }
   0xc   : > { %s2239_s25 = smov 111   ;;  %s2240_s26 = smov 113   ;;  %2213 = vset.pattern.permute.xlu1 %v2241_v2  ;;  %2215 = vset.pattern.permute.xlu0 %v2241_v2  ;;  %v2061_v4 = vld [vmem:[%s3689_s4 + $0x40] sm:$0xff]  ;;  %v2080_v9 = vld [vmem:[%s3689_s4 + $0x1d8] sm:$0xff]  ;;  %v2078_v11 = vld [vmem:[%s3689_s4 + $0x1c8] sm:$0xff] }
   0xd   : > { %s3835_s19 = smov (!%p215_p3, %s2034_s19), 1  ;;  %2214 = vset.pattern.permute.xlu2 %v2241_v2  ;;  %s2242_s27 = smov 127   ;;  %v2063_v6 = vld [vmem:[%s3689_s4 + $0x60] sm:$0xff]  ;;  %v2084_v10 = vld [vmem:[%s3689_s4 + $0x1f8] sm:$0xff]  ;;  %v2079_v12 = vld [vmem:[%s3689_s4 + $0x1d0] sm:$0xff]  ;;  %v2378_v19 = vand.u32 127, %v241_v18 }
   0xe   : > { %s2188_s20 = sshll.u32 %s3835_s19, 4  ;;  %s2243_s28 = smov 1   ;;  %v2065_v8 = vld [vmem:[%s3689_s4 + $0x80] sm:$0xff]  ;;  %v2082_v13 = vld [vmem:[%s3689_s4 + $0x1e8] sm:$0xff]  ;;  %v2096_v17 = vld [vmem:[%s3689_s4 + $0x258] sm:$0xff] }
   0xf   : > { %s2293_s23 = scalar_lea.vmem %s3685_s0, %s2188_s20  ;;  %s2244_s29 = smov 15   ;;  %v2089_v14 = vld [vmem:[%s3689_s4 + $0x220] sm:$0xff]  ;;  %v369_v16 = vld [vmem:[%s3689_s4 + $0x8] sm:$0xff]  ;;  %v2083_v20 = vld [vmem:[%s3689_s4 + $0x1f0] sm:$0xff]  ;;  %v2390_v24 = vadd.s32 128, %v2378_v19  ;;  %v244_v30 = vand.u32 15, %v2378_v19 }
  0x10   : > { %v2296_v0 = vld [vmem:[%s2293_s23] sm:$0xff]  ;;  %v2305_v1 = vld [vmem:[%s2293_s23 + $0x8] sm:$0xff]  ;;  %s2245_s30 = smov 16   ;;  %s2246_s6 = smov 17   ;;  %v2095_v23 = vld [vmem:[%s3689_s4 + $0x250] sm:$0xff]  ;;  %vm3691_vm2 = vcmp.lt.s32.totalorder %v2378_v19, 111 }
  0x11   : > { %342 = vrot.lane.b32.xlu1 %v2296_v0, %s2238_s24  ;;  %355 = vrot.lane.b32.xlu0 %v2296_v0, %s2239_s25  ;;  %v2077_v15 = vld [vmem:[%s3689_s4 + $0x1c0] sm:$0xff]  ;;  %v2064_v22 = vld [vmem:[%s3689_s4 + $0x68] sm:$0xff]  ;;  %v245_v27 = vand.u32 15, %v2390_v24  ;;  %vm3692_vm1 = vcmp.lt.s32.totalorder %v2390_v24, 240  ;;  %vm2409_vm3 = vcmp.lt.s32.totalorder %v244_v30, 15  ;;  %vm3693_vm6 = vcmp.lt.s32.totalorder %v2378_v19, 112 }
  0x12   : > { %329 = vrot.lane.b32.xlu2 %v2296_v0, %s2240_s26  ;;  %v2088_v28 = vld [vmem:[%s3689_s4 + $0x218] sm:$0xff]  ;;  %v2066_v29 = vld [vmem:[%s3689_s4 + $0x88] sm:$0xff]  ;;  %v2087_v39 = vld [vmem:[%s3689_s4 + $0x210] sm:$0xff]  ;;  %vm3694_vm7 = vcmp.lt.s32.totalorder %v2378_v19, 113  ;;  %vm2442_vm8 = vcmp.ge.s32.totalorder %v244_v30, 1  ;;  %vm3695_vm10 = vcmp.lt.s32.totalorder %v2378_v19, 127 }
  0x13   : > { %v2100_v31 = vld [vmem:[%s3689_s4 + $0x278] sm:$0xff]  ;;  %vm2403_vm0 = vcmp.lt.s32.totalorder %v245_v27, 15  ;;  %vm2421_vm5 = vcmp.ge.s32.totalorder %v245_v27, 1  ;;  %v2067_v46 = vld [vmem:[%s3689_s4 + $0x90] sm:$0xff]  ;;  %v2081_v56 = vld [vmem:[%s3689_s4 + $0x1e0] sm:$0xff]  ;;  %vm3696_vm11 = vcmp.lt.s32.totalorder %v2378_v19, 1 }
  0x14   : > { %vm2417_vm4 = vmand %vm3692_vm1, %vm2403_vm0  ;;  %v2099_v48 = vld [vmem:[%s3689_s4 + $0x270] sm:$0xff]  ;;  %v2092_v51 = vld [vmem:[%s3689_s4 + $0x238] sm:$0xff]  ;;  %vm3698_vm12 = vcmp.ge.s32.totalorder %v2378_v19, 16  ;;  %vm3697_vm13 = vcmp.lt.s32.totalorder %v2378_v19, 15  ;;  %vm281_vm15 = vcmp.lt.s32.totalorder %v2378_v19, 16 }
  0x15   : > { %vm2450_vm9 = vmand %vm3692_vm1, %vm2421_vm5  ;;  %v2104_v57 = vld [vmem:[%s3689_s4 + $0x298] sm:$0xff]  ;;  %v2094_v59 = vld [vmem:[%s3689_s4 + $0x248] sm:$0xff] }
  0x16   : > { %vm2504_vm14 = vmand %vm3698_vm12, %vm2409_vm3  ;;  %v2101_v27 = vld [vmem:[%s3689_s4 + $0x280] sm:$0xff]  ;;  %v2110_v30 = vld [vmem:[%s3689_s4 + $0x2c8] sm:$0xff] }
  0x19   : > { %344 = vrot.lane.b32.xlu1 %v2305_v1, %s2238_s24  ;;  %357 = vrot.lane.b32.xlu0 %v2305_v1, %s2239_s25 }
  0x1a   : > { %331 = vrot.lane.b32.xlu2 %v2305_v1, %s2240_s26 }
  0x21   : > { %318 = vrot.lane.b32.xlu1 %v2305_v1, %s2242_s27  ;;  %316 = vrot.lane.b32.xlu0 %v2296_v0, %s2242_s27 }
  0x22   : > { %303 = vrot.lane.b32.xlu2 %v2296_v0, %s2243_s28 }
  0x29   : > { %290 = vrot.lane.b32.xlu1 %v2296_v0, %s2244_s29  ;;  %305 = vrot.lane.b32.xlu0 %v2305_v1, %s2243_s28 }
  0x2a   : > { %292 = vrot.lane.b32.xlu2 %v2305_v1, %s2244_s29 }
  0x31   : > { %279 = vrot.lane.b32.xlu1 %v2305_v1, %s2245_s30  ;;  %277 = vrot.lane.b32.xlu0 %v2296_v0, %s2245_s30 }
  0x32   : > { %264 = vrot.lane.b32.xlu2 %v2296_v0, %s2246_s6 }
  0x39   : > { %266 = vrot.lane.b32.xlu0 %v2305_v1, %s2246_s6  ;;  %372 = vperm.xlu1 %2213, %v368_v3   ;;  %v2086_v3 = vld [vmem:[%s3689_s4 + $0x208] sm:$0xff] }
  0x3a   : > { %377 = vperm.xlu2 %2214, %v369_v16   ;;  %v262_v16 = vld [vmem:[%s3686_s1] sm:$0xff] }
  0x41   : > { %514 = vperm.xlu1 %2213, %v2061_v4   ;;  %519 = vperm.xlu0 %2215, %v2062_v5   ;;  %v2103_v4 = vld [vmem:[%s3689_s4 + $0x290] sm:$0xff]  ;;  %v2093_v5 = vld [vmem:[%s3689_s4 + $0x240] sm:$0xff] }
  0x42   : > { %533 = vperm.xlu2 %2214, %v2064_v22   ;;  %v2097_v22 = vld [vmem:[%s3689_s4 + $0x260] sm:$0xff] }
  0x49   : > { %528 = vperm.xlu1 %2213, %v2063_v6   ;;  %562 = vperm.xlu0 %2215, %v2068_v7  }
  0x4a   : > { %552 = vperm.xlu2 %2214, %v2066_v29   ;;  %v2105_v29 = vld [vmem:[%s3689_s4 + $0x2a0] sm:$0xff] }
  0x51   : > { %547 = vperm.xlu1 %2213, %v2065_v8   ;;  %680 = vperm.xlu0 %2215, %v2078_v11   ;;  %v2108_v11 = vld [vmem:[%s3689_s4 + $0x2b8] sm:$0xff] }
  0x52   : > { %557 = vperm.xlu2 %2214, %v2067_v46  }
  0x59   : > { %690 = vperm.xlu1 %2213, %v2080_v9   ;;  %745 = vperm.xlu0 %2215, %v2082_v13   ;;  %v2098_v13 = vld [vmem:[%s3689_s4 + $0x268] sm:$0xff] }
  0x5a   : > { %740 = vperm.xlu2 %2214, %v2081_v56  }
  0x61   : > { %755 = vperm.xlu1 %2213, %v2084_v10   ;;  %675 = vperm.xlu0 %2215, %v2077_v15   ;;  %v2085_v10 = vld [vmem:[%s3689_s4 + $0x200] sm:$0xff] }
  0x62   : > { %818 = vperm.xlu2 %2214, %v2086_v3  }
  0x69   : > { %685 = vperm.xlu1 %2213, %v2079_v12   ;;  %750 = vperm.xlu0 %2215, %v2083_v20   ;;  %v2090_v20 = vld [vmem:[%s3689_s4 + $0x228] sm:$0xff] }
  0x6a   : > { %813 = vperm.xlu2 %2214, %v2085_v10  }
  0x6c   : > { %v330_v21 = vpop.permute.xlu2 %329 }
  0x71   : > { %886 = vperm.xlu1 %2213, %v2089_v14   ;;  %828 = vperm.xlu0 %2215, %v2088_v28   ;;  %v2106_v28 = vld [vmem:[%s3689_s4 + $0x2a8] sm:$0xff]  ;;  %v2229_v14 = vld [vmem:[%s2293_s23] sm:$0xff] }
  0x72   : > { %891 = vperm.xlu2 %2214, %v2090_v20  }
  0x74   : > { %v332_v32 = vpop.permute.xlu2 %331 }
  0x75   : > { %v334_v49 = vsel %vm3694_vm7, %v330_v21, %v332_v32  ;;  %v335_v50 = vsel %vm3694_vm7, %v332_v32, %v330_v21  ;;  %v2107_v21 = vld [vmem:[%s3689_s4 + $0x2b0] sm:$0xff] }
  0x79   : > { %942 = vperm.xlu1 %2213, %v2096_v17   ;;  %823 = vperm.xlu0 %2215, %v2087_v39  }
  0x7c   : > { %v304_v47 = vpop.permute.xlu2 %303 }
  0x81   : > { %937 = vperm.xlu1 %2213, %v2095_v23   ;;  %901 = vperm.xlu0 %2215, %v2092_v51   ;;  %v263_v23 = vld [vmem:[%s3686_s1 + $0x8] sm:$0xff] }
  0x83   : > { %v343_v25 = vpop.permute.xlu1 %342  ;;  %v356_v26 = vpop.permute.xlu0 %355 }
  0x84   : > { %v293_v58 = vpop.permute.xlu2 %292 }
  0x89   : > { %1015 = vperm.xlu1 %2213, %v2100_v31   ;;  %932 = vperm.xlu0 %2215, %v2094_v59   ;;  %v2247_v31 = vmov 16.0  }
  0x8a   : > { %2216 = vrcp.f32 %v2247_v31 }
  0x8b   : > { %v345_v36 = vpop.permute.xlu1 %344  ;;  %v358_v37 = vpop.permute.xlu0 %357 }
  0x8c   : > { %v360_v40 = vsel %vm3691_vm2, %v356_v26, %v358_v37  ;;  %v361_v41 = vsel %vm3691_vm2, %v358_v37, %v356_v26  ;;  %v347_v42 = vsel %vm3693_vm6, %v343_v25, %v345_v36  ;;  %v348_v43 = vsel %vm3693_vm6, %v345_v36, %v343_v25  ;;  %v265_v12 = vpop.permute.xlu2 %264  ;;  %v2091_v25 = vld [vmem:[%s3689_s4 + $0x230] sm:$0xff]  ;;  %v2102_v26 = vld [vmem:[%s3689_s4 + $0x288] sm:$0xff] }
  0x8d   : > { %2043 = vmatpush.msk.msra.mxu0 %vm2409_vm3, %v360_v40  ;;  %2052 = vmatpush.msk.msra.mxu1 %vm2417_vm4, %v361_v41  ;;  %vm3710_vm2 = vcmp.lt.s32.totalorder %v2378_v19, 17  ;;  %vm380_vm6 = vcmask 588800  }
  0x8e   : > { %896 = vperm.xlu2 %2214, %v2091_v25  }
  0x8f   : > { %395 = vmatpush.msra.mxu0 %v347_v42  ;;  %2053 = vmatpush.msk.msra.mxu1 %vm3692_vm1, %v348_v43  ;;  %vm2550_vm1 = vmand %vm3698_vm12, %vm2442_vm8 }
  0x90   : > { %v2217_v37 = vpop.eup %2216 }
  0x91   : > { %2044 = vmatpush.msk.msra.mxu0 %vm2442_vm8, %v334_v49  ;;  %2054 = vmatpush.msk.msra.mxu1 %vm2450_vm9, %v335_v50  ;;  %v454_v40 = vmul.f32 16.0, %v2217_v37 }
  0x92   : > { %1010 = vperm.xlu1 %2213, %v2099_v48   ;;  %927 = vperm.xlu0 %2215, %v2093_v5  }
  0x93   : > { %v319_v52 = vpop.permute.xlu1 %318  ;;  %v317_v53 = vpop.permute.xlu0 %316  ;;  %v455_v50 = vsub.f32 1.0, %v454_v40 }
  0x94   : > { %v321_v54 = vsel %vm3695_vm10, %v317_v53, %v319_v52  ;;  %v322_v55 = vsel %vm3695_vm10, %v319_v52, %v317_v53  ;;  %v378_v41 = vpop.permute.xlu2 %377 }
  0x95   : > { %2045 = vmatpush.msk.msra.mxu0 %vm2409_vm3, %v321_v54  ;;  %2055 = vmatpush.msk.msra.mxu1 %vm2403_vm0, %v322_v55  ;;  %v456_v55 = vmul.f32 %v2217_v37, %v455_v50 }
  0x97   : > { %398 = vmatpush.msra.mxu0 %v2296_v0  ;;  %421 = vmatpush.msra.mxu1 %v2305_v1 }
  0x9a   : > { %1088 = vperm.xlu1 %2213, %v2104_v57   ;;  %1005 = vperm.xlu0 %2215, %v2098_v13  }
  0x9b   : > { %v291_v60 = vpop.permute.xlu1 %290  ;;  %v306_v61 = vpop.permute.xlu0 %305 }
  0x9c   : > { %v309_v62 = vsel %vm3696_vm11, %v306_v61, %v304_v47  ;;  %v308_v63 = vsel %vm3696_vm11, %v304_v47, %v306_v61  ;;  %v296_v1 = vsel %vm3697_vm13, %v293_v58, %v291_v60  ;;  %v295_v2 = vsel %vm3697_vm13, %v291_v60, %v293_v58 }
  0x9d   : > { %2046 = vmatpush.msk.msra.mxu0 %vm2442_vm8, %v309_v62  ;;  %2056 = vmatpush.msk.msra.mxu1 %vm2421_vm5, %v308_v63  ;;  %v457_v60 = vadd.f32 %v2217_v37, %v456_v55 }
  0x9f   : > { %2047 = vmatpush.msk.msra.mxu0 %vm2504_vm14, %v296_v1  ;;  %2057 = vmatpush.msk.msra.mxu1 %vm2403_vm0, %v295_v2 }
  0xa2   : > { %1083 = vperm.xlu1 %2213, %v2103_v4   ;;  %1000 = vperm.xlu0 %2215, %v2097_v22  }
  0xa3   : > { %v280_v6 = vpop.permute.xlu1 %279  ;;  %v278_v7 = vpop.permute.xlu0 %277 }
  0xa4   : > { %v283_v8 = vsel %vm281_vm15, %v280_v6, %v278_v7  ;;  %v282_v9 = vsel %vm281_vm15, %v278_v7, %v280_v6 }
  0xa5   : > { %2048 = vmatpush.msk.msra.mxu0 %vm3698_vm12, %v283_v8  ;;  %424 = vmatpush.msra.mxu1 %v282_v9 }
  0xaa   : > { %1161 = vperm.xlu1 %2213, %v2108_v11   ;;  %1078 = vperm.xlu0 %2215, %v2102_v26  }
  0xab   : > { %v267_v15 = vpop.permute.xlu0 %266  ;;  %v373_v39 = vpop.permute.xlu1 %372 }
  0xac   : > { %v270_v17 = vsel %vm3710_vm2, %v267_v15, %v265_v12  ;;  %v269_v18 = vsel %vm3710_vm2, %v265_v12, %v267_v15 }
  0xad   : > { %2049 = vmatpush.msk.msra.mxu0 %vm2550_vm1, %v270_v17  ;;  %2058 = vmatpush.msk.msra.mxu1 %vm2421_vm5, %v269_v18 }
  0xae   : > { %2050 = vmatmul.msk.f32.vlgmr.msra.gmra.mxu0 %vm380_vm6, %v262_v16  ;;  %2059 = vmatmul.msk.f32.vlgmr.msra.gmra.mxu1 %vm380_vm6, %v262_v16 }
  0xb2   : > { %1156 = vperm.xlu1 %2213, %v2107_v21   ;;  %1073 = vperm.xlu0 %2215, %v2101_v27  }
  0xb6   : > { %2051 = vmatmul.msk.f32.gmra.mxu0 %vm380_vm6, %v263_v23  ;;  %2060 = vmatmul.msk.f32.gmra.mxu1 %vm380_vm6, %v263_v23  ;;  %vm458_vm6 = vweird.f32 %v2217_v37 }
  0xb7   : > { %v2611_v2 = vsel %vm458_vm6, %v2217_v37, %v457_v60 }
  0xb8   : > { %3731 = vst [vmem:[#allocation6_spill] sm:$0xff] %v2611_v2 }
  0xba   : > { %1151 = vperm.xlu0 %2215, %v2106_v28  }
  0xc2   : > { %1146 = vperm.xlu0 %2215, %v2105_v29  }
  0xca   : > { %1224 = vperm.xlu0 %2215, %v2110_v30  }
 0x12b   : > { %v404_v32 = vpop.f32.mrf.mxu0  ;;  %v427_v36 = vpop.f32.mrf.mxu1 }
 0x12c   : > { %v2599_v42 = vadd.f32 %v427_v36, %v373_v39  ;;  %v2601_v47 = vadd.f32 %v404_v32, %v373_v39 }
 0x12e   : > { %3727 = vst [vmem:[#allocation2_spill] sm:$0xff] %v2599_v42 }
 0x12f   : > { %3728 = vst [vmem:[#allocation3_spill] sm:$0xff] %v2601_v47 }
 0x133   : > { %v407_v43 = vpop.f32.mrf.mxu0  ;;  %v430_v46 = vpop.f32.mrf.mxu1 }
 0x134   : > { %v2603_v48 = vadd.f32 %v407_v43, %v378_v41  ;;  %v2605_v49 = vadd.f32 %v430_v46, %v378_v41 }
 0x136   : > { %3729 = vst [vmem:[#allocation4_spill] sm:$0xff] %v2603_v48  ;;  %v439_v51 = vadd.f32 %v2603_v48, %v2601_v47  ;;  %v446_v52 = vadd.f32 %v2605_v49, %v2599_v42 }
 0x137   : > { %3730 = vst [vmem:[#allocation5_spill] sm:$0xff] %v2605_v49 }
 0x138   : > { %v440_v53 = vrot.slane %v439_v51, 4  ;;  %v447_v54 = vrot.slane %v446_v52, 4 }
 0x13a   : > { %v441_v56 = vadd.f32 %v440_v53, %v439_v51  ;;  %v448_v57 = vadd.f32 %v447_v54, %v446_v52  ;;  %v515_v54 = vpop.permute.xlu1 %514 }
 0x13c   : > { %v442_v58 = vrot.slane %v441_v56, 2  ;;  %v449_v59 = vrot.slane %v448_v57, 2 }
 0x13e   : > { %v443_v61 = vadd.f32 %v442_v58, %v441_v56  ;;  %v450_v62 = vadd.f32 %v449_v59, %v448_v57 }
 0x140   : > { %v444_v63 = vrot.slane %v443_v61, 1  ;;  %v451_v1 = vrot.slane %v450_v62, 1 }
 0x142   : > { %v445_v3 = vadd.f32 %v444_v63, %v443_v61  ;;  %v452_v4 = vadd.f32 %v451_v1, %v450_v62  ;;  %v520_v63 = vpop.permute.xlu0 %519 }
 0x144   : > { %v460_v5 = vmul.f32 %v2611_v2, %v445_v3  ;;  %v461_v6 = vmul.f32 %v2611_v2, %v452_v4 }
 0x146   : > { %v462_v7 = vsub.f32 %v2601_v47, %v460_v5  ;;  %v464_v8 = vsub.f32 %v2603_v48, %v460_v5  ;;  %v463_v9 = vsub.f32 %v2599_v42, %v461_v6  ;;  %v465_v10 = vsub.f32 %v2605_v49, %v461_v6  ;;  %v534_v6 = vpop.permute.xlu2 %533 }
 0x148   : > { %v466_v11 = vmul.f32 %v462_v7, %v462_v7  ;;  %v468_v12 = vmul.f32 %v464_v8, %v464_v8  ;;  %v467_v13 = vmul.f32 %v463_v9, %v463_v9  ;;  %v469_v15 = vmul.f32 %v465_v10, %v465_v10 }
 0x14a   : > { %v470_v16 = vadd.f32 %v468_v12, %v466_v11  ;;  %v477_v17 = vadd.f32 %v469_v15, %v467_v13  ;;  %v529_v15 = vpop.permute.xlu1 %528 }
 0x14c   : > { %v471_v18 = vrot.slane %v470_v16, 4  ;;  %v478_v20 = vrot.slane %v477_v17, 4 }
 0x14e   : > { %v472_v21 = vadd.f32 %v471_v18, %v470_v16  ;;  %v479_v22 = vadd.f32 %v478_v20, %v477_v17  ;;  %v227_v18 = vld [vmem:[%s3688_s3] sm:$0xff]  ;;  %v2641_v20 = vpop.permute.xlu0 %562 }
 0x150   : > { %v473_v23 = vrot.slane %v472_v21, 2  ;;  %v480_v25 = vrot.slane %v479_v22, 2 }
 0x152   : > { %v474_v26 = vadd.f32 %v473_v23, %v472_v21  ;;  %v481_v27 = vadd.f32 %v480_v25, %v479_v22  ;;  %v548_v25 = vpop.permute.xlu1 %547 }
 0x154   : > { %v475_v28 = vrot.slane %v474_v26, 1  ;;  %v482_v29 = vrot.slane %v481_v27, 1 }
 0x156   : > { %v476_v30 = vadd.f32 %v475_v28, %v474_v26  ;;  %v483_v31 = vadd.f32 %v482_v29, %v481_v27  ;;  %v2643_v21 = vpop.permute.xlu0 %680 }
 0x158   : > { %v484_v32 = vmul.f32 %v476_v30, %v2611_v2  ;;  %v485_v36 = vmul.f32 %v483_v31, %v2611_v2 }
 0x15a   : > { %v486_v37 = vadd.f32 1e-06, %v484_v32  ;;  %v487_v39 = vadd.f32 1e-06, %v485_v36  ;;  %v2651_v27 = vpop.permute.xlu1 %690 }
 0x15c   : > { %2218 = vrsqrt.f32 %v486_v37  ;;  %vm494_vm10 = vweird.f32 %v486_v37  ;;  %vm504_vm13 = vweird.f32 %v487_v39 }
 0x15d   : > { %2220 = vrsqrt.f32 %v487_v39 }
 0x15e   : > { %v2645_v22 = vpop.permute.xlu0 %745 }
 0x162   : > { %v2219_v40 = vpop.eup %2218  ;;  %v2665_v36 = vpop.permute.xlu1 %755 }
 0x163   : > { %v2221_v41 = vpop.eup %2220  ;;  %v489_v43 = vmul.f32 %v2219_v40, %v486_v37  ;;  %vm495_vm6 = vweird.f32 %v2219_v40 }
 0x164   : > { %v499_v46 = vmul.f32 %v2221_v41, %v487_v39  ;;  %vm505_vm7 = vweird.f32 %v2221_v41  ;;  %vm496_vm11 = vmor %vm494_vm10, %vm495_vm6  ;;  %vm3737_vm10 = vcmp.ge.s32.totalorder %v2378_v19, 16 }
 0x165   : > { %v490_v50 = vmul.f32 %v2219_v40, %v489_v43  ;;  %vm506_vm12 = vmor %vm504_vm13, %vm505_vm7  ;;  %vm565_vm7 = vcmask 130048   ;;  %vm3740_vm13 = vcmp.lt.s32.totalorder %v2378_v19, 1 }
 0x166   : > { %v500_v51 = vmul.f32 %v2221_v41, %v499_v46  ;;  %v2647_v23 = vpop.permute.xlu0 %675  ;;  %vm3741_vm6 = vmmov %vm3740_vm13 }
 0x167   : > { %v491_v52 = vmul.f32 0.5, %v490_v50 }
 0x168   : > { %v501_v53 = vmul.f32 0.5, %v500_v51 }
 0x169   : > { %v492_v55 = vsub.f32 1.5, %v491_v52 }
 0x16a   : > { %v502_v56 = vsub.f32 1.5, %v501_v53  ;;  %v2679_v43 = vpop.permute.xlu1 %685 }
 0x16b   : > { %v493_v57 = vmul.f32 %v2219_v40, %v492_v55 }
 0x16c   : > { %v503_v58 = vmul.f32 %v2221_v41, %v502_v56 }
 0x16d   : > { %v497_v59 = vsel %vm496_vm11, %v2219_v40, %v493_v57  ;;  %v553_v40 = vpop.permute.xlu2 %552  ;;  %vm3738_vm11 = vcmp.lt.s32.totalorder %v2378_v19, 15 }
 0x16e   : > { %v510_v60 = vmul.f32 %v497_v59, %v464_v8  ;;  %v507_v61 = vsel %vm506_vm12, %v2221_v41, %v503_v58  ;;  %v508_v62 = vmul.f32 %v497_v59, %v462_v7  ;;  %v228_v8 = vld [vmem:[%s3688_s3 + $0x8] sm:$0xff]  ;;  %v2649_v26 = vpop.permute.xlu0 %750  ;;  %vm3739_vm12 = vmmov %vm3738_vm11 }
 0x16f   : > { %v511_v1 = vmul.f32 %v507_v61, %v465_v10  ;;  %v509_v3 = vmul.f32 %v507_v61, %v463_v9  ;;  %v229_v9 = vld [vmem:[%s3688_s3 + $0x10] sm:$0xff]  ;;  %v230_v10 = vld [vmem:[%s3688_s3 + $0x18] sm:$0xff] }
 0x170   : > { %v524_v4 = vmul.f32 %v520_v63, %v510_v60  ;;  %v522_v5 = vmul.f32 %v515_v54, %v508_v62 }
 0x171   : > { %v525_v11 = vmul.f32 %v520_v63, %v511_v1  ;;  %v523_v12 = vmul.f32 %v515_v54, %v509_v3 }
 0x172   : > { %v538_v13 = vadd.f32 %v534_v6, %v524_v4  ;;  %v536_v17 = vadd.f32 %v529_v15, %v522_v5  ;;  %v2695_v52 = vpop.permute.xlu1 %886 }
 0x173   : > { %v539_v16 = vadd.f32 %v534_v6, %v525_v11  ;;  %v537_v7 = vadd.f32 %v529_v15, %v523_v12 }
 0x174   : > { %592 = vmatpush.msra.mxu2 %v538_v13 }
 0x175   : > { %621 = vmatpush.msra.mxu3 %v539_v16  ;;  %v558_v54 = vpop.permute.xlu2 %557 }
 0x176   : > { %593 = vmatpush.msra.mxu2 %v536_v17  ;;  %v2653_v28 = vpop.permute.xlu0 %828 }
 0x177   : > { %622 = vmatpush.msra.mxu3 %v537_v7  ;;  %2069 = vmatmul.msk.f32.vlgmr.msra.gmra.mxu2 %vm565_vm7, %v227_v18 }
 0x178   : > { %2073 = vmatmul.msk.f32.vlgmr.msra.gmra.mxu3 %vm565_vm7, %v227_v18 }
 0x17a   : > { %v2705_v56 = vpop.permute.xlu1 %942 }
 0x17b   : > { %3733 = vst [vmem:[#allocation8_spill] sm:$0xff] %v2705_v56 }
 0x17d   : > { %v2717_v59 = vpop.permute.xlu2 %740 }
 0x17e   : > { %v2667_v37 = vpop.permute.xlu0 %823 }
 0x17f   : > { %2070 = vmatmul.msk.f32.gmra.mxu2 %vm565_vm7, %v228_v8 }
 0x180   : > { %2074 = vmatmul.msk.f32.gmra.mxu3 %vm565_vm7, %v228_v8 }
 0x182   : > { %v2719_v60 = vpop.permute.xlu1 %937 }
 0x185   : > { %v2729_v62 = vpop.permute.xlu2 %818 }
 0x186   : > { %v2681_v46 = vpop.permute.xlu0 %901 }
 0x187   : > { %2071 = vmatmul.msk.f32.gmra.mxu2 %vm565_vm7, %v229_v9  ;;  %3732 = vst [vmem:[#allocation7_spill] sm:$0xff] %v2681_v46 }
 0x188   : > { %2075 = vmatmul.msk.f32.gmra.mxu3 %vm565_vm7, %v229_v9 }
 0x18a   : > { %v2733_v63 = vpop.permute.xlu1 %1015 }
 0x18b   : > { %3734 = vst [vmem:[#allocation9_spill] sm:$0xff] %v2733_v63 }
 0x18d   : > { %v2741_v3 = vpop.permute.xlu2 %813 }
 0x18e   : > { %v2697_v53 = vpop.permute.xlu0 %932 }
 0x18f   : > { %2072 = vmatmul.msk.f32.gmra.mxu2 %vm565_vm7, %v230_v10 }
 0x190   : > { %2076 = vmatmul.msk.f32.gmra.mxu3 %vm565_vm7, %v230_v10 }
 0x192   : > { %v2749_v4 = vpop.permute.xlu1 %1010 }
 0x195   : > { %v2753_v6 = vpop.permute.xlu2 %891 }
 0x196   : > { %v2707_v57 = vpop.permute.xlu0 %927 }
 0x19a   : > { %v2761_v12 = vpop.permute.xlu1 %1088 }
 0x19b   : > { %3735 = vst [vmem:[#allocation10_spill] sm:$0xff] %v2761_v12 }
 0x19d   : > { %v2771_v15 = vpop.permute.xlu2 %896 }
 0x19e   : > { %v2721_v61 = vpop.permute.xlu0 %1005 }
 0x1a2   : > { %v2773_v17 = vpop.permute.xlu1 %1083 }
 0x1a6   : > { %v2735_v1 = vpop.permute.xlu0 %1000 }
 0x1ae   : > { %v2751_v5 = vpop.permute.xlu0 %1078 }
 0x1b6   : > { %v2763_v13 = vpop.permute.xlu0 %1073 }
 0x1be   : > { %v2775_v18 = vpop.permute.xlu0 %1151 }
 0x1fa   : > { %v595_v29 = vpop.f32.mrf.mxu2 }
 0x1fb   : > { %v2655_v30 = vadd.f32 %v595_v29, %v548_v25  ;;  %v624_v31 = vpop.f32.mrf.mxu3  ;;  %v2793_v29 = vpop.permute.xlu1 %1161 }
 0x1fc   : > { %v2657_v32 = vadd.f32 %v624_v31, %v548_v25  ;;  %3736 = vst [vmem:[#allocation11_spill] sm:$0xff] %v2793_v29  ;;  %v2795_v31 = vpop.permute.xlu0 %1146 }
 0x1fd   : > { %636 = vrot.lane.b32.xlu2 %v2655_v30, %s2246_s6 }
 0x1fe   : > { %782 = vrot.lane.b32.xlu0 %v2657_v32, %s2244_s29  ;;  %644 = vrot.lane.b32.xlu1 %v2657_v32, %s2246_s6 }
 0x202   : > { %v598_v39 = vpop.f32.mrf.mxu2 }
 0x203   : > { %v2675_v41 = vadd.f32 %v598_v39, %v553_v40  ;;  %v627_v50 = vpop.f32.mrf.mxu3 }
 0x204   : > { %v2687_v51 = vadd.f32 %v627_v50, %v553_v40  ;;  %v2111_v40 = vld [vmem:[%s3689_s4 + $0x2d0] sm:$0xff]  ;;  %v2810_v50 = vpop.permute.xlu1 %1156 }
 0x205   : > { %701 = vrot.lane.b32.xlu2 %v2655_v30, %s2245_s30 }
 0x206   : > { %855 = vrot.lane.b32.xlu0 %v2657_v32, %s2243_s28  ;;  %709 = vrot.lane.b32.xlu1 %v2657_v32, %s2245_s30 }
 0x20a   : > { %v601_v55 = vpop.f32.mrf.mxu2 }
 0x20b   : > { %v2709_v58 = vadd.f32 %v601_v55, %v558_v54  ;;  %v630_v11 = vpop.f32.mrf.mxu3 }
 0x20c   : > { %v2786_v10 = vadd.f32 %v630_v11, %v558_v54  ;;  %v2812_v54 = vpop.permute.xlu0 %1224 }
 0x20d   : > { %961 = vrot.lane.b32.xlu2 %v2655_v30, %s2242_s27 }
 0x20e   : > { %638 = vrot.lane.b32.xlu0 %v2675_v41, %s2246_s6  ;;  %774 = vrot.lane.b32.xlu1 %v2655_v30, %s2244_s29 }
 0x212   : > { %v604_v9 = vpop.f32.mrf.mxu2 }
 0x213   : > { %v633_v16 = vpop.f32.mrf.mxu3  ;;  %v2789_v25 = vadd.f32 %v604_v9, %v2641_v20 }
 0x214   : > { %v2778_v7 = vadd.f32 %v633_v16, %v2641_v20 }
 0x215   : > { %1034 = vrot.lane.b32.xlu2 %v2655_v30, %s2240_s26 }
 0x216   : > { %711 = vrot.lane.b32.xlu0 %v2687_v51, %s2245_s30  ;;  %847 = vrot.lane.b32.xlu1 %v2655_v30, %s2243_s28 }
 0x21d   : > { %1107 = vrot.lane.b32.xlu2 %v2655_v30, %s2238_s24 }
 0x21e   : > { %857 = vrot.lane.b32.xlu0 %v2687_v51, %s2243_s28  ;;  %969 = vrot.lane.b32.xlu1 %v2657_v32, %s2242_s27 }
 0x225   : > { %1180 = vrot.lane.b32.xlu2 %v2655_v30, %s2239_s25 }
 0x226   : > { %640 = vrot.lane.b32.xlu0 %v2709_v58, %s2246_s6  ;;  %1042 = vrot.lane.b32.xlu1 %v2657_v32, %s2240_s26 }
 0x22d   : > { %646 = vrot.lane.b32.xlu2 %v2687_v51, %s2246_s6 }
 0x22e   : > { %705 = vrot.lane.b32.xlu0 %v2709_v58, %s2245_s30  ;;  %1115 = vrot.lane.b32.xlu1 %v2657_v32, %s2238_s24 }
 0x235   : > { %776 = vrot.lane.b32.xlu2 %v2675_v41, %s2244_s29 }
 0x236   : > { %965 = vrot.lane.b32.xlu0 %v2709_v58, %s2242_s27  ;;  %1188 = vrot.lane.b32.xlu1 %v2657_v32, %s2239_s25 }
 0x23d   : > { %963 = vrot.lane.b32.xlu2 %v2675_v41, %s2242_s27 }
 0x23e   : > { %1038 = vrot.lane.b32.xlu0 %v2709_v58, %s2240_s26  ;;  %703 = vrot.lane.b32.xlu1 %v2675_v41, %s2245_s30 }
 0x245   : > { %1036 = vrot.lane.b32.xlu2 %v2675_v41, %s2240_s26 }
 0x246   : > { %1111 = vrot.lane.b32.xlu0 %v2709_v58, %s2238_s24  ;;  %784 = vrot.lane.b32.xlu1 %v2687_v51, %s2244_s29 }
 0x24d   : > { %1109 = vrot.lane.b32.xlu2 %v2675_v41, %s2238_s24 }
 0x24e   : > { %1184 = vrot.lane.b32.xlu0 %v2709_v58, %s2239_s25  ;;  %849 = vrot.lane.b32.xlu1 %v2675_v41, %s2243_s28 }
 0x255   : > { %1182 = vrot.lane.b32.xlu2 %v2675_v41, %s2239_s25 }
 0x256   : > { %971 = vrot.lane.b32.xlu1 %v2687_v51, %s2242_s27  ;;  %650 = vrot.lane.b32.xlu0 %v2778_v7, %s2246_s6 }
 0x257   : > { %v637_v8 = vpop.permute.xlu2 %636 }
 0x25d   : > { %648 = vrot.lane.b32.xlu2 %v2786_v10, %s2246_s6 }
 0x25e   : > { %1044 = vrot.lane.b32.xlu1 %v2687_v51, %s2240_s26  ;;  %780 = vrot.lane.b32.xlu0 %v2789_v25, %s2244_s29 }
 0x25f   : > { %v702_v39 = vpop.permute.xlu2 %701 }
 0x265   : > { %713 = vrot.lane.b32.xlu2 %v2786_v10, %s2245_s30 }
 0x266   : > { %1117 = vrot.lane.b32.xlu1 %v2687_v51, %s2238_s24  ;;  %1229 = vperm.xlu0 %2215, %v2111_v40  }
 0x267   : > { %v2808_v20 = vpop.permute.xlu2 %961 }
 0x26d   : > { %778 = vrot.lane.b32.xlu2 %v2709_v58, %s2244_s29 }
 0x26e   : > { %1190 = vrot.lane.b32.xlu1 %v2687_v51, %s2239_s25  ;;  %967 = vrot.lane.b32.xlu0 %v2789_v25, %s2242_s27 }
 0x26f   : > { %v2820_v55 = vpop.permute.xlu2 %1034 }
 0x270   : > { %v645_v11 = vpop.permute.xlu1 %644  ;;  %v783_v16 = vpop.permute.xlu0 %782 }
 0x271   : > { %v652_v9 = vsel %vm3710_vm2, %v637_v8, %v645_v11  ;;  %v656_v40 = vsel %vm3710_vm2, %v645_v11, %v637_v8 }
 0x272   : > { %v661_v2 = vsel %vm2421_vm5, %v652_v9, 0.0  ;;  %v660_v48 = vsel %vm2550_vm1, %v656_v40, 0.0 }
 0x273   : > { %v694_v29 = vmul.f32 %v2647_v23, %v661_v2  ;;  %v693_v63 = vmul.f32 %v2647_v23, %v660_v48 }
 0x275   : > { %851 = vrot.lane.b32.xlu2 %v2709_v58, %s2243_s28 }
 0x276   : > { %786 = vrot.lane.b32.xlu1 %v2786_v10, %s2244_s29  ;;  %1040 = vrot.lane.b32.xlu0 %v2789_v25, %s2240_s26 }
 0x277   : > { %v2834_v49 = vpop.permute.xlu2 %1107 }
 0x278   : > { %v710_v42 = vpop.permute.xlu1 %709  ;;  %v856_v47 = vpop.permute.xlu0 %855 }
 0x279   : > { %v717_v8 = vsel %vm281_vm15, %v702_v39, %v710_v42  ;;  %v721_v11 = vsel %vm281_vm15, %v710_v42, %v702_v39 }
 0x27a   : > { %v725_v12 = vsel %vm3737_vm10, %v721_v11, 0.0  ;;  %v759_v9 = vmul.f32 %v2717_v59, %v717_v8  ;;  %vm3742_vm10 = vcmp.lt.s32.totalorder %v2378_v19, 127 }
 0x27b   : > { %v758_v56 = vmul.f32 %v2717_v59, %v725_v12 }
 0x27c   : > { %v767_v40 = vadd.f32 %v759_v9, %v694_v29 }
 0x27d   : > { %v766_v46 = vadd.f32 %v758_v56, %v693_v63  ;;  %973 = vrot.lane.b32.xlu2 %v2786_v10, %s2242_s27 }
 0x27e   : > { %859 = vrot.lane.b32.xlu1 %v2786_v10, %s2243_s28  ;;  %1113 = vrot.lane.b32.xlu0 %v2789_v25, %s2238_s24 }
 0x27f   : > { %v2854_v42 = vpop.permute.xlu2 %1180 }
 0x280   : > { %v775_v2 = vpop.permute.xlu1 %774  ;;  %v639_v39 = vpop.permute.xlu0 %638 }
 0x281   : > { %v790_v48 = vsel %vm3738_vm11, %v775_v2, %v783_v16  ;;  %v794_v23 = vsel %vm3739_vm12, %v783_v16, %v775_v2  ;;  %vm3743_vm11 = vmmov %vm3742_vm10  ;;  %vm3744_vm12 = vcmp.lt.s32.totalorder %v2378_v19, 113 }
 0x282   : > { %v798_v56 = vsel %vm2504_vm14, %v794_v23, 0.0  ;;  %v799_v59 = vsel %vm2403_vm0, %v790_v48, 0.0 }
 0x283   : > { %v831_v63 = vmul.f32 %v2741_v3, %v798_v56  ;;  %v832_v12 = vmul.f32 %v2741_v3, %v799_v59 }
 0x285   : > { %v839_v29 = vadd.f32 %v831_v63, %v766_v46  ;;  %v840_v8 = vadd.f32 %v832_v12, %v767_v40  ;;  %1046 = vrot.lane.b32.xlu2 %v2786_v10, %s2240_s26 }
 0x286   : > { %1186 = vrot.lane.b32.xlu0 %v2789_v25, %s2239_s25  ;;  %642 = vrot.lane.b32.xlu1 %v2789_v25, %s2246_s6 }
 0x287   : > { %v647_v16 = vpop.permute.xlu2 %646 }
 0x288   : > { %v848_v11 = vpop.permute.xlu1 %847  ;;  %v2874_v9 = vsel %vm3710_vm2, %v639_v39, %v647_v16  ;;  %v2878_v3 = vsel %vm3710_vm2, %v647_v16, %v639_v39  ;;  %v2888_v23 = vpop.permute.xlu0 %711  ;;  %v2113_v39 = vld [vmem:[%s3689_s4 + $0xa0] sm:$0xff]  ;;  %v946_v16 = vmul.f32 %v2707_v57, %v2657_v32 }
 0x289   : > { %v863_v46 = vsel %vm3740_vm13, %v848_v11, %v856_v47  ;;  %v867_v40 = vsel %vm3741_vm6, %v856_v47, %v848_v11  ;;  %v945_v47 = vmul.f32 %v2707_v57, %v2655_v30  ;;  %vm3745_vm13 = vmmov %vm3744_vm12  ;;  %vm3746_vm6 = vcmp.lt.s32.totalorder %v2378_v19, 112 }
 0x28a   : > { %v871_v2 = vsel %vm2442_vm8, %v867_v40, 0.0  ;;  %v872_v48 = vsel %vm2421_vm5, %v863_v46, 0.0 }
 0x28b   : > { %v904_v56 = vmul.f32 %v2695_v52, %v871_v2  ;;  %v905_v59 = vmul.f32 %v2695_v52, %v872_v48 }
 0x28d   : > { %v912_v63 = vadd.f32 %v904_v56, %v839_v29  ;;  %v913_v12 = vadd.f32 %v905_v59, %v840_v8  ;;  %1119 = vrot.lane.b32.xlu2 %v2786_v10, %s2238_s24 }
 0x28e   : > { %1260 = vperm.xlu0 %2215, %v2113_v39   ;;  %715 = vrot.lane.b32.xlu1 %v2778_v7, %s2245_s30 }
 0x28f   : > { %v953_v52 = vadd.f32 %v945_v47, %v912_v63  ;;  %v954_v11 = vadd.f32 %v946_v16, %v913_v12  ;;  %v2903_v46 = vpop.permute.xlu2 %776 }
 0x290   : > { %v970_v40 = vpop.permute.xlu1 %969  ;;  %v2917_v48 = vpop.permute.xlu0 %857 }
 0x291   : > { %v977_v29 = vsel %vm3742_vm10, %v2808_v20, %v970_v40  ;;  %v981_v30 = vsel %vm3743_vm11, %v970_v40, %v2808_v20  ;;  %vm3747_vm10 = vmmov %vm3746_vm6  ;;  %vm3748_vm11 = vcmp.lt.s32.totalorder %v2390_v24, 240 }
 0x292   : > { %v985_v32 = vsel %vm2409_vm3, %v977_v29, 0.0  ;;  %v986_v57 = vsel %vm2403_vm0, %v981_v30, 0.0 }
 0x293   : > { %v1018_v8 = vmul.f32 %v2735_v1, %v985_v32  ;;  %v1019_v2 = vmul.f32 %v2735_v1, %v986_v57 }
 0x295   : > { %v1026_v56 = vadd.f32 %v1018_v8, %v953_v52  ;;  %v1027_v59 = vadd.f32 %v1019_v2, %v954_v11  ;;  %1192 = vrot.lane.b32.xlu2 %v2786_v10, %s2239_s25  ;;  %v2112_v11 = vld [vmem:[%s3689_s4 + $0x2d8] sm:$0xff] }
 0x296   : > { %861 = vrot.lane.b32.xlu1 %v2778_v7, %s2243_s28 }
 0x297   : > { %v2923_v20 = vpop.permute.xlu2 %963 }
 0x298   : > { %v1043_v39 = vpop.permute.xlu1 %1042 }
 0x299   : > { %v1050_v63 = vsel %vm3744_vm12, %v2820_v55, %v1043_v39  ;;  %v1054_v1 = vsel %vm3745_vm13, %v1043_v39, %v2820_v55  ;;  %v641_v55 = vpop.permute.xlu0 %640  ;;  %vm3749_vm12 = vcmp.lt.s32.totalorder %v2378_v19, 111 }
 0x29a   : > { %v1058_v12 = vsel %vm2442_vm8, %v1050_v63, 0.0  ;;  %v1059_v47 = vsel %vm2450_vm9, %v1054_v1, 0.0  ;;  %vm3750_vm13 = vmmov %vm3749_vm12 }
 0x29b   : > { %v1091_v16 = vmul.f32 %v2763_v13, %v1058_v12  ;;  %v1092_v52 = vmul.f32 %v2763_v13, %v1059_v47 }
 0x29d   : > { %v1099_v40 = vadd.f32 %v1091_v16, %v1026_v56  ;;  %v1100_v29 = vadd.f32 %v1092_v52, %v1027_v59  ;;  %707 = vrot.lane.b32.xlu2 %v2789_v25, %s2245_s30  ;;  %v2114_v59 = vld [vmem:[%s3689_s4 + $0xa8] sm:$0xff]  ;;  %v2115_v16 = vld [vmem:[%s3689_s4 + $0xb0] sm:$0xff]  ;;  %v663_v52 = vsel %vm2421_vm5, %v2874_v9, 0.0 }
 0x29e   : > { %1234 = vperm.xlu1 %2213, %v2112_v11  }
 0x29f   : > { %v2942_v30 = vpop.permute.xlu2 %1036 }
 0x2a0   : > { %v1116_v32 = vpop.permute.xlu1 %1115 }
 0x2a1   : > { %v1123_v57 = vsel %vm3746_vm6, %v2834_v49, %v1116_v32  ;;  %v1127_v13 = vsel %vm3747_vm10, %v1116_v32, %v2834_v49  ;;  %v706_v1 = vpop.permute.xlu0 %705  ;;  %vm3751_vm6 = vcmp.ge.s32.totalorder %v2378_v19, 16  ;;  %vm3752_vm10 = vcmp.lt.s32.totalorder %v2378_v19, 15 }
 0x2a2   : > { %v1132_v8 = vsel %vm3748_vm11, %v1127_v13, 0.0  ;;  %v1164_v2 = vmul.f32 %v2795_v31, %v1123_v57  ;;  %v696_v57 = vmul.f32 %v2643_v21, %v663_v52  ;;  %vm3753_vm11 = vmmov %vm3752_vm10 }
 0x2a3   : > { %v1165_v56 = vmul.f32 %v2795_v31, %v1132_v8 }
 0x2a4   : > { %v2957_v39 = vadd.f32 %v1164_v2, %v1099_v40  ;;  %v662_v40 = vsel %vm2550_vm1, %v2878_v3, 0.0  ;;  %v2109_v3 = vld [vmem:[%s3689_s4 + $0x2c0] sm:$0xff] }
 0x2a5   : > { %788 = vrot.lane.b32.xlu2 %v2778_v7, %s2244_s29  ;;  %v2961_v63 = vadd.f32 %v1165_v56, %v1100_v29  ;;  %v695_v2 = vmul.f32 %v2643_v21, %v662_v40 }
 0x2a6   : > { %1265 = vperm.xlu1 %2213, %v2114_v59  }
 0x2a7   : > { %v2963_v49 = vpop.permute.xlu2 %1109 }
 0x2a8   : > { %v1189_v12 = vpop.permute.xlu1 %1188 }
 0x2a9   : > { %v2968_v31 = vsel %vm3749_vm12, %v2854_v42, %v1189_v12  ;;  %v2973_v47 = vsel %vm3750_vm13, %v1189_v12, %v2854_v42  ;;  %v2995_v13 = vpop.permute.xlu0 %965  ;;  %vm3754_vm12 = vcmp.lt.s32.totalorder %v2378_v19, 1 }
 0x2aa   : > { %vm3755_vm13 = vmmov %vm3754_vm12 }
 0x2ad   : > { %853 = vrot.lane.b32.xlu2 %v2789_v25, %s2243_s28 }
 0x2ae   : > { %1270 = vperm.xlu1 %2213, %v2115_v16  }
 0x2af   : > { %v2983_v11 = vpop.permute.xlu2 %1182 }
 0x2b0   : > { %v704_v42 = vpop.permute.xlu1 %703 }
 0x2b1   : > { %v718_v29 = vsel %vm281_vm15, %v704_v42, %v2888_v23  ;;  %v722_v32 = vsel %vm281_vm15, %v2888_v23, %v704_v42 }
 0x2b2   : > { %v727_v9 = vsel %vm3751_vm6, %v722_v32, 0.0  ;;  %v761_v8 = vmul.f32 %v2645_v22, %v718_v29 }
 0x2b3   : > { %v760_v56 = vmul.f32 %v2645_v22, %v727_v9  ;;  %v3021_v9 = vpop.permute.xlu0 %1038 }
 0x2b4   : > { %v769_v59 = vadd.f32 %v761_v8, %v696_v57 }
 0x2b5   : > { %v768_v12 = vadd.f32 %v760_v56, %v695_v2  ;;  %1219 = vperm.xlu2 %2214, %v2109_v3  }
 0x2b7   : > { %v649_v23 = vpop.permute.xlu2 %648 }
 0x2b8   : > { %v785_v16 = vpop.permute.xlu1 %784  ;;  %v654_v52 = vsel %vm3710_vm2, %v641_v55, %v649_v23  ;;  %v658_v42 = vsel %vm3710_vm2, %v649_v23, %v641_v55 }
 0x2b9   : > { %v791_v29 = vsel %vm3752_vm10, %v2903_v46, %v785_v16  ;;  %v795_v21 = vsel %vm3753_vm11, %v785_v16, %v2903_v46  ;;  %v665_v3 = vsel %vm2421_vm5, %v654_v52, 0.0  ;;  %v664_v46 = vsel %vm2550_vm1, %v658_v42, 0.0 }
 0x2ba   : > { %v800_v22 = vsel %vm2504_vm14, %v795_v21, 0.0  ;;  %v801_v40 = vsel %vm2403_vm0, %v791_v29, 0.0  ;;  %v698_v56 = vmul.f32 %v2679_v43, %v665_v3  ;;  %v697_v29 = vmul.f32 %v2679_v43, %v664_v46 }
 0x2bb   : > { %v833_v32 = vmul.f32 %v2729_v62, %v800_v22  ;;  %v834_v57 = vmul.f32 %v2729_v62, %v801_v40  ;;  %v1112_v43 = vpop.permute.xlu0 %1111  ;;  %vm3756_vm10 = vcmp.lt.s32.totalorder %v2378_v19, 127 }
 0x2bc   : > { %vm3757_vm11 = vmmov %vm3756_vm10 }
 0x2bd   : > { %v841_v55 = vadd.f32 %v833_v32, %v768_v12  ;;  %v842_v8 = vadd.f32 %v834_v57, %v769_v59  ;;  %975 = vrot.lane.b32.xlu2 %v2778_v7, %s2242_s27 }
 0x2bf   : > { %v714_v2 = vpop.permute.xlu2 %713 }
 0x2c0   : > { %v850_v23 = vpop.permute.xlu1 %849  ;;  %v719_v62 = vsel %vm281_vm15, %v706_v1, %v714_v2  ;;  %v723_v12 = vsel %vm281_vm15, %v714_v2, %v706_v1 }
 0x2c1   : > { %v864_v59 = vsel %vm3754_vm12, %v850_v23, %v2917_v48  ;;  %v868_v16 = vsel %vm3755_vm13, %v2917_v48, %v850_v23  ;;  %v729_v52 = vsel %vm3751_vm6, %v723_v12, 0.0  ;;  %v763_v42 = vmul.f32 %v2649_v26, %v719_v62  ;;  %vm3760_vm6 = vmmov %vm3756_vm10 }
 0x2c2   : > { %v873_v21 = vsel %vm2442_vm8, %v868_v16, 0.0  ;;  %v874_v1 = vsel %vm2421_vm5, %v864_v59, 0.0  ;;  %v762_v22 = vmul.f32 %v2649_v26, %v729_v52  ;;  %v947_v62 = vmul.f32 %v2697_v53, %v2675_v41 }
 0x2c3   : > { %v906_v40 = vmul.f32 %v2753_v6, %v873_v21  ;;  %v907_v32 = vmul.f32 %v2753_v6, %v874_v1  ;;  %v3051_v48 = vadd.f32 %v763_v42, %v698_v56  ;;  %v948_v26 = vmul.f32 %v2697_v53, %v2687_v51  ;;  %v3075_v42 = vpop.permute.xlu0 %1184 }
 0x2c4   : > { %v3053_v57 = vadd.f32 %v762_v22, %v697_v29  ;;  %vm3758_vm12 = vcmp.lt.s32.totalorder %v2378_v19, 113 }
 0x2c5   : > { %v914_v3 = vadd.f32 %v906_v40, %v841_v55  ;;  %v915_v2 = vadd.f32 %v907_v32, %v842_v8  ;;  %1048 = vrot.lane.b32.xlu2 %v2778_v7, %s2240_s26  ;;  %vm3759_vm13 = vmmov %vm3758_vm12 }
 0x2c7   : > { %v779_v46 = vpop.permute.xlu2 %778  ;;  %v955_v12 = vadd.f32 %v947_v62, %v914_v3  ;;  %v956_v59 = vadd.f32 %v948_v26, %v915_v2 }
 0x2c8   : > { %v972_v23 = vpop.permute.xlu1 %971 }
 0x2c9   : > { %v978_v6 = vsel %vm3756_vm10, %v2923_v20, %v972_v23  ;;  %v982_v55 = vsel %vm3757_vm11, %v972_v23, %v2923_v20  ;;  %vm3761_vm10 = vmmov %vm3760_vm6  ;;  %vm3762_vm11 = vcmp.lt.s32.totalorder %v2378_v19, 112 }
 0x2ca   : > { %v987_v8 = vsel %vm2409_vm3, %v978_v6, 0.0  ;;  %v988_v56 = vsel %vm2403_vm0, %v982_v55, 0.0 }
 0x2cb   : > { %v1020_v41 = vmul.f32 %v2721_v61, %v987_v8  ;;  %v1021_v51 = vmul.f32 %v2721_v61, %v988_v56  ;;  %v3103_v6 = vpop.permute.xlu0 %650  ;;  %v2116_v56 = vld [vmem:[%s3689_s4 + $0xb8] sm:$0xff] }
 0x2cd   : > { %v1028_v53 = vadd.f32 %v1020_v41, %v955_v12  ;;  %v1029_v16 = vadd.f32 %v1021_v51, %v956_v59  ;;  %1121 = vrot.lane.b32.xlu2 %v2778_v7, %s2238_s24 }
 0x2cf   : > { %v852_v52 = vpop.permute.xlu2 %851 }
 0x2d0   : > { %v1045_v20 = vpop.permute.xlu1 %1044 }
 0x2d1   : > { %v1051_v29 = vsel %vm3758_vm12, %v2942_v30, %v1045_v20  ;;  %v1055_v21 = vsel %vm3759_vm13, %v1045_v20, %v2942_v30  ;;  %vm3763_vm12 = vmmov %vm3762_vm11  ;;  %vm3764_vm13 = vcmp.lt.s32.totalorder %v2390_v24, 240 }
 0x2d2   : > { %v1060_v61 = vsel %vm2442_vm8, %v1051_v29, 0.0  ;;  %v1061_v1 = vsel %vm2450_vm9, %v1055_v21, 0.0 }
 0x2d3   : > { %v1093_v22 = vmul.f32 %v2751_v5, %v1060_v61  ;;  %v1094_v40 = vmul.f32 %v2751_v5, %v1061_v1  ;;  %v3130_v1 = vpop.permute.xlu0 %780 }
 0x2d5   : > { %v1101_v32 = vadd.f32 %v1093_v22, %v1028_v53  ;;  %v1102_v3 = vadd.f32 %v1094_v40, %v1029_v16  ;;  %1194 = vrot.lane.b32.xlu2 %v2778_v7, %s2239_s25 }
 0x2d7   : > { %v974_v2 = vpop.permute.xlu2 %973 }
 0x2d8   : > { %v1118_v23 = vpop.permute.xlu1 %1117  ;;  %v979_v30 = vsel %vm3760_vm6, %v2995_v13, %v974_v2  ;;  %v983_v62 = vsel %vm3761_vm10, %v974_v2, %v2995_v13  ;;  %vm3765_vm6 = vcmp.lt.s32.totalorder %v2378_v19, 113 }
 0x2d9   : > { %v1124_v26 = vsel %vm3762_vm11, %v2963_v49, %v1118_v23  ;;  %v1128_v5 = vsel %vm3763_vm12, %v1118_v23, %v2963_v49  ;;  %vm3766_vm10 = vmmov %vm3765_vm6  ;;  %vm3767_vm11 = vcmp.lt.s32.totalorder %v2378_v19, 111 }
 0x2da   : > { %v1134_v55 = vsel %vm3764_vm13, %v1128_v5, 0.0  ;;  %v1166_v8 = vmul.f32 %v2775_v18, %v1124_v26  ;;  %vm3768_vm12 = vmmov %vm3767_vm11  ;;  %vm3769_vm13 = vcmp.lt.s32.totalorder %v2378_v19, 112 }
 0x2db   : > { %v1167_v13 = vmul.f32 %v2775_v18, %v1134_v55 }
 0x2dc   : > { %v1174_v12 = vadd.f32 %v1166_v8, %v1101_v32 }
 0x2dd   : > { %1275 = vperm.xlu2 %2214, %v2116_v56   ;;  %v1175_v59 = vadd.f32 %v1167_v13, %v1102_v3  ;;  %v1230_v56 = vpop.permute.xlu0 %1229 }
 0x2df   : > { %v1047_v41 = vpop.permute.xlu2 %1046 }
 0x2e0   : > { %v1191_v51 = vpop.permute.xlu1 %1190  ;;  %v1052_v49 = vsel %vm3765_vm6, %v3021_v9, %v1047_v41  ;;  %v1056_v53 = vsel %vm3766_vm10, %v1047_v41, %v3021_v9  ;;  %vm3770_vm6 = vmmov %vm3769_vm13  ;;  %vm3771_vm10 = vcmp.lt.s32.totalorder %v2378_v19, 15 }
 0x2e1   : > { %v1197_v16 = vsel %vm3767_vm11, %v2983_v11, %v1191_v51  ;;  %v1201_v18 = vsel %vm3768_vm12, %v1191_v51, %v2983_v11  ;;  %vm3772_vm11 = vmmov %vm3771_vm10  ;;  %vm3773_vm12 = vcmp.lt.s32.totalorder %v2378_v19, 1 }
 0x2e2   : > { %v1206_v20 = vsel %vm2409_vm3, %v1197_v16, 0.0  ;;  %v1207_v29 = vsel %vm2417_vm4, %v1201_v18, 0.0  ;;  %v949_v18 = vmul.f32 %v2719_v60, %v2709_v58 }
 0x2e3   : > { %v1239_v21 = vmul.f32 %v2812_v54, %v1206_v20  ;;  %v1240_v61 = vmul.f32 %v2812_v54, %v1207_v29 }
 0x2e5   : > { %v3132_v9 = vadd.f32 %v1239_v21, %v1174_v12  ;;  %v3134_v22 = vadd.f32 %v1240_v61, %v1175_v59 }
 0x2e7   : > { %v1120_v40 = vpop.permute.xlu2 %1119 }
 0x2e8   : > { %v787_v32 = vpop.permute.xlu1 %786  ;;  %v1125_v11 = vsel %vm3769_vm13, %v1112_v43, %v1120_v40  ;;  %v1129_v3 = vsel %vm3770_vm6, %v1120_v40, %v1112_v43  ;;  %vm3774_vm13 = vmmov %vm3773_vm12  ;;  %vm3775_vm6 = vcmp.lt.s32.totalorder %v2378_v19, 111 }
 0x2e9   : > { %v792_v2 = vsel %vm3771_vm10, %v779_v46, %v787_v32  ;;  %v796_v54 = vsel %vm3772_vm11, %v787_v32, %v779_v46  ;;  %vm3776_vm10 = vmmov %vm3775_vm6  ;;  %v3182_v32 = vpop.permute.xlu0 %967  ;;  %vm3777_vm11 = vcmp.lt.s32.totalorder %v2390_v24, 240 }
 0x2ea   : > { %v802_v23 = vsel %vm2504_vm14, %v796_v54, 0.0  ;;  %v803_v26 = vsel %vm2403_vm0, %v792_v2, 0.0 }
 0x2eb   : > { %v835_v5 = vmul.f32 %v2667_v37, %v802_v23  ;;  %v836_v55 = vmul.f32 %v2667_v37, %v803_v26  ;;  %v989_v37 = vsel %vm2409_vm3, %v979_v30, 0.0  ;;  %v1062_v30 = vsel %vm2442_vm8, %v1052_v49, 0.0 }
 0x2ec   : > { %v1022_v21 = vmul.f32 %v2749_v4, %v989_v37  ;;  %v1095_v2 = vmul.f32 %v2773_v17, %v1062_v30 }
 0x2ed   : > { %v843_v8 = vadd.f32 %v835_v5, %v3053_v57  ;;  %v844_v43 = vadd.f32 %v836_v55, %v3051_v48  ;;  %v990_v48 = vsel %vm2403_vm0, %v983_v62, 0.0  ;;  %v1063_v62 = vsel %vm2450_vm9, %v1056_v53, 0.0 }
 0x2ee   : > { %v1023_v61 = vmul.f32 %v2749_v4, %v990_v48  ;;  %v1136_v4 = vsel %vm3777_vm11, %v1129_v3, 0.0  ;;  %v1096_v53 = vmul.f32 %v2773_v17, %v1063_v62 }
 0x2ef   : > { %v1193_v13 = vpop.permute.xlu2 %1192  ;;  %v1169_v55 = vmul.f32 %v2810_v50, %v1136_v4 }
 0x2f0   : > { %v860_v12 = vpop.permute.xlu1 %859  ;;  %v1198_v58 = vsel %vm3775_vm6, %v3075_v42, %v1193_v13 }
 0x2f1   : > { %v865_v46 = vsel %vm3773_vm12, %v852_v52, %v860_v12  ;;  %v869_v59 = vsel %vm3774_vm13, %v860_v12, %v852_v52  ;;  %v950_v52 = vmul.f32 %v2719_v60, %v2786_v10  ;;  %v1202_v60 = vsel %vm3776_vm10, %v1193_v13, %v3075_v42  ;;  %v1041_v37 = vpop.permute.xlu0 %1040 }
 0x2f2   : > { %v875_v41 = vsel %vm2442_vm8, %v869_v59, 0.0  ;;  %v876_v51 = vsel %vm2421_vm5, %v865_v46, 0.0  ;;  %v1208_v26 = vsel %vm2409_vm3, %v1198_v58, 0.0  ;;  %v1209_v5 = vsel %vm2417_vm4, %v1202_v60, 0.0 }
 0x2f3   : > { %v908_v57 = vmul.f32 %v2771_v15, %v875_v41  ;;  %v909_v16 = vmul.f32 %v2771_v15, %v876_v51  ;;  %v1168_v42 = vmul.f32 %v2810_v50, %v1125_v11  ;;  %v1241_v3 = vmul.f32 %v1230_v56, %v1208_v26 }
 0x2f4   : > { %v1242_v13 = vmul.f32 %v1230_v56, %v1209_v5  ;;  %v1204_v11 = vsel %vm2409_vm3, %v2968_v31, 0.0  ;;  %v1205_v50 = vsel %vm2417_vm4, %v2973_v47, 0.0  ;;  %vm3778_vm12 = vcmp.lt.s32.totalorder %v2378_v19, 15 }
 0x2f5   : > { %v916_v20 = vadd.f32 %v908_v57, %v843_v8  ;;  %v917_v29 = vadd.f32 %v909_v16, %v844_v43  ;;  %vm3779_vm13 = vcmp.ge.s32.totalorder %v2378_v19, 16  ;;  %vm3780_vm6 = vmmov %vm3778_vm12  ;;  %vm3781_vm10 = vcmp.lt.s32.totalorder %v2378_v19, 1 }
 0x2f6   : > { %vm3782_vm11 = vmmov %vm3781_vm10 }
 0x2f7   : > { %v957_v40 = vadd.f32 %v949_v18, %v916_v20  ;;  %v958_v15 = vadd.f32 %v950_v52, %v917_v29  ;;  %v708_v10 = vpop.permute.xlu2 %707 }
 0x2f8   : > { %v643_v49 = vpop.permute.xlu1 %642 }
 0x2f9   : > { %v1030_v54 = vadd.f32 %v1022_v21, %v957_v40  ;;  %v1031_v23 = vadd.f32 %v1023_v61, %v958_v15  ;;  %v3194_v16 = vpop.permute.xlu0 %1113  ;;  %v655_v47 = vsel %vm3710_vm2, %v643_v49, %v3103_v6  ;;  %v659_v40 = vsel %vm3710_vm2, %v3103_v6, %v643_v49 }
 0x2fa   : > { %v666_v58 = vsel %vm2550_vm1, %v659_v40, 0.0  ;;  %v667_v60 = vsel %vm2421_vm5, %v655_v47, 0.0 }
 0x2fb   : > { %v1103_v8 = vadd.f32 %v1095_v2, %v1030_v54  ;;  %v1104_v43 = vadd.f32 %v1096_v53, %v1031_v23  ;;  %v699_v23 = vmul.f32 %v2651_v27, %v666_v58  ;;  %v700_v26 = vmul.f32 %v2651_v27, %v667_v60 }
 0x2fd   : > { %v1176_v12 = vadd.f32 %v1168_v42, %v1103_v8  ;;  %v1177_v46 = vadd.f32 %v1169_v55, %v1104_v43 }
 0x2ff   : > { %v789_v59 = vpop.permute.xlu2 %788  ;;  %v1249_v17 = vadd.f32 %v1241_v3, %v1176_v12  ;;  %v1250_v41 = vadd.f32 %v1242_v13, %v1177_v46 }
 0x300   : > { %v716_v51 = vpop.permute.xlu1 %715  ;;  %v797_v6 = vsel %vm3780_vm6, %v789_v59, %v3130_v1  ;;  %vm3786_vm6 = vcmp.lt.s32.totalorder %v2378_v19, 113 }
 0x301   : > { %v3206_v61 = vpop.permute.xlu0 %1186  ;;  %v724_v31 = vsel %vm281_vm15, %v716_v51, %v708_v10 }
 0x302   : > { %v731_v15 = vsel %vm3779_vm13, %v724_v31, 0.0 }
 0x303   : > { %v764_v49 = vmul.f32 %v2665_v36, %v731_v15  ;;  %v3790_v15 = vld [vmem:[#allocation9_spill] sm:$0xff] }
 0x305   : > { %v772_v46 = vadd.f32 %v764_v49, %v699_v23 }
 0x307   : > { %v854_v48 = vpop.permute.xlu2 %853 }
 0x308   : > { %v862_v57 = vpop.permute.xlu1 %861 }
 0x309   : > { %v866_v2 = vsel %vm3781_vm10, %v854_v48, %v862_v57  ;;  %v870_v53 = vsel %vm3782_vm11, %v862_v57, %v854_v48  ;;  %v1261_v5 = vpop.permute.xlu0 %1260  ;;  %v3783_v57 = vld [vmem:[#allocation7_spill] sm:$0xff]  ;;  %vm3787_vm10 = vmmov %vm3786_vm6  ;;  %vm3789_vm11 = vcmp.lt.s32.totalorder %v2378_v19, 112 }
 0x30a   : > { %v877_v13 = vsel %vm2442_vm8, %v870_v53, 0.0  ;;  %v878_v12 = vsel %vm2421_vm5, %v866_v2, 0.0 }
 0x30f   : > { %v1220_v56 = vpop.permute.xlu2 %1219 }
 0x310   : > { %v1237_v18 = vmul.f32 %v1220_v56, %v1204_v11  ;;  %v1238_v52 = vmul.f32 %v1220_v56, %v1205_v50  ;;  %v3202_v20 = vpop.permute.xlu1 %1234  ;;  %v910_v11 = vmul.f32 %v3783_v57, %v877_v13 }
 0x312   : > { %v1245_v29 = vadd.f32 %v1237_v18, %v2957_v39  ;;  %v1246_v21 = vadd.f32 %v1238_v52, %v2961_v63  ;;  %v793_v39 = vsel %vm3778_vm12, %v3130_v1, %v789_v59  ;;  %v720_v63 = vsel %vm281_vm15, %v708_v10, %v716_v51 }
 0x313   : > { %v805_v4 = vsel %vm2403_vm0, %v793_v39, 0.0  ;;  %v765_v10 = vmul.f32 %v2665_v36, %v720_v63  ;;  %v804_v1 = vsel %vm2504_vm14, %v797_v6, 0.0  ;;  %vm3784_vm12 = vcmp.lt.s32.totalorder %v2378_v19, 127  ;;  %v3788_v39 = vld [vmem:[#allocation8_spill] sm:$0xff] }
 0x314   : > { %v1278_v55 = vadd.f32 %v1261_v5, %v1245_v29  ;;  %v1279_v8 = vadd.f32 %v1261_v5, %v1246_v21  ;;  %v838_v3 = vmul.f32 %v2653_v28, %v805_v4  ;;  %v837_v48 = vmul.f32 %v2653_v28, %v804_v1  ;;  %vm3785_vm13 = vmmov %vm3784_vm12  ;;  %v3794_v1 = vld [vmem:[#allocation11_spill] sm:$0xff] }
 0x315   : > { %v773_v59 = vadd.f32 %v765_v10, %v700_v26  ;;  %v3793_v10 = vld [vmem:[#allocation10_spill] sm:$0xff] }
 0x316   : > { %v845_v18 = vadd.f32 %v837_v48, %v772_v46 }
 0x317   : > { %v976_v30 = vpop.permute.xlu2 %975  ;;  %v846_v56 = vadd.f32 %v838_v3, %v773_v59 }
 0x318   : > { %v3208_v62 = vpop.permute.xlu1 %1265  ;;  %v984_v50 = vsel %vm3785_vm13, %v976_v30, %v3182_v32  ;;  %v918_v47 = vadd.f32 %v910_v11, %v845_v18  ;;  %vm3792_vm13 = vcmp.lt.s32.totalorder %v2390_v24, 240 }
 0x319   : > { %v992_v28 = vsel %vm2403_vm0, %v984_v50, 0.0 }
 0x31a   : > { %v1025_v60 = vmul.f32 %v3790_v15, %v992_v28 }
 0x31f   : > { %v1049_v54 = vpop.permute.xlu2 %1048 }
 0x320   : > { %v1271_v42 = vpop.permute.xlu1 %1270  ;;  %v1053_v21 = vsel %vm3786_vm6, %v1041_v37, %v1049_v54  ;;  %v1057_v31 = vsel %vm3787_vm10, %v1049_v54, %v1041_v37  ;;  %vm3795_vm6 = vcmp.lt.s32.totalorder %v2378_v19, 111 }
 0x321   : > { %v1282_v43 = vadd.f32 %v1271_v42, %v1249_v17  ;;  %v1283_v36 = vadd.f32 %v1271_v42, %v1250_v41  ;;  %v911_v17 = vmul.f32 %v3783_v57, %v878_v12  ;;  %v980_v41 = vsel %vm3784_vm12, %v3182_v32, %v976_v30  ;;  %vm3791_vm12 = vmmov %vm3789_vm11 }
 0x322   : > { %v991_v29 = vsel %vm2409_vm3, %v980_v41, 0.0  ;;  %v952_v32 = vmul.f32 %v3788_v39, %v2778_v7  ;;  %v951_v30 = vmul.f32 %v3788_v39, %v2789_v25  ;;  %v1064_v6 = vsel %vm2442_vm8, %v1053_v21, 0.0  ;;  %vm3796_vm10 = vmmov %vm3795_vm6  ;;  %v2148_v39 = vld [vmem:[%s3689_s4 + $0x188] sm:$0xff] }
 0x323   : > { %v3249_v27 = vmul.f32 %v1282_v43, %v1278_v55  ;;  %v3251_v51 = vmul.f32 %v1283_v36, %v1279_v8  ;;  %v919_v40 = vadd.f32 %v911_v17, %v846_v56  ;;  %v1024_v58 = vmul.f32 %v3790_v15, %v991_v29  ;;  %v2154_v15 = vld [vmem:[%s3689_s4 + $0x1a8] sm:$0xff] }
 0x324   : > { %v1065_v37 = vsel %vm2450_vm9, %v1057_v31, 0.0  ;;  %v959_v4 = vadd.f32 %v951_v30, %v918_v47  ;;  %v1097_v2 = vmul.f32 %v3793_v10, %v1064_v6  ;;  %v1281_v17 = vadd.f32 %v3208_v62, %v3134_v22  ;;  %v232_v22 = vld [vmem:[%s3688_s3 + $0x28] sm:$0xff]  ;;  %v2131_v31 = vld [vmem:[%s3689_s4 + $0x120] sm:$0xff]  ;;  %v2138_v47 = vld [vmem:[%s3689_s4 + $0x178] sm:$0xff] }
 0x325   : > { %v960_v49 = vadd.f32 %v952_v32, %v919_v40  ;;  %v1098_v53 = vmul.f32 %v3793_v10, %v1065_v37  ;;  %v2130_v40 = vld [vmem:[%s3689_s4 + $0x108] sm:$0xff]  ;;  %v2153_v30 = vld [vmem:[%s3689_s4 + $0x1a0] sm:$0xff] }
 0x326   : > { %v1032_v54 = vadd.f32 %v1024_v58, %v959_v4  ;;  %v2136_v32 = vld [vmem:[%s3689_s4 + $0x168] sm:$0xff]  ;;  %v2248_v58 = vmov 256.0  }
 0x327   : > { %v1122_v52 = vpop.permute.xlu2 %1121  ;;  %v1033_v23 = vadd.f32 %v1025_v60, %v960_v49  ;;  %2222 = vrcp.f32 %v2248_v58 }
 0x328   : > { %v1130_v63 = vsel %vm3789_vm11, %v1122_v52, %v3194_v16  ;;  %v1126_v7 = vsel %vm3791_vm12, %v3194_v16, %v1122_v52  ;;  %v1105_v36 = vadd.f32 %v1097_v2, %v1032_v54 }
 0x329   : > { %v1138_v25 = vsel %vm3792_vm13, %v1130_v63, 0.0  ;;  %v1170_v5 = vmul.f32 %v3794_v1, %v1126_v7  ;;  %v1106_v3 = vadd.f32 %v1098_v53, %v1033_v23  ;;  %v2137_v63 = vld [vmem:[%s3689_s4 + $0x170] sm:$0xff] }
 0x32a   : > { %v1171_v42 = vmul.f32 %v3794_v1, %v1138_v25  ;;  %v2122_v25 = vld [vmem:[%s3689_s4 + $0xc8] sm:$0xff] }
 0x32b   : > { %v1178_v46 = vadd.f32 %v1170_v5, %v1105_v36  ;;  %v2123_v5 = vld [vmem:[%s3689_s4 + $0xe0] sm:$0xff] }
 0x32c   : > { %v1179_v59 = vadd.f32 %v1171_v42, %v1106_v3  ;;  %v2124_v42 = vld [vmem:[%s3689_s4 + $0xe8] sm:$0xff]  ;;  %v2135_v36 = vld [vmem:[%s3689_s4 + $0x160] sm:$0xff] }
 0x32d   : > { %v2223_v60 = vpop.eup %2222  ;;  %v2147_v3 = vld [vmem:[%s3689_s4 + $0x180] sm:$0xff] }
 0x32e   : > { %v1349_v6 = vmul.f32 256.0, %v2223_v60  ;;  %vm1353_vm11 = vweird.f32 %v2223_v60 }
 0x32f   : > { %v1195_v26 = vpop.permute.xlu2 %1194 }
 0x330   : > { %v1199_v55 = vsel %vm3795_vm6, %v3206_v61, %v1195_v26  ;;  %v1203_v16 = vsel %vm3796_vm10, %v1195_v26, %v3206_v61  ;;  %v1280_v61 = vadd.f32 %v3208_v62, %v3132_v9  ;;  %v231_v9 = vld [vmem:[%s3688_s3 + $0x20] sm:$0xff]  ;;  %v1350_v37 = vsub.f32 1.0, %v1349_v6 }
 0x331   : > { %v1210_v8 = vsel %vm2409_vm3, %v1199_v55, 0.0  ;;  %v1211_v43 = vsel %vm2417_vm4, %v1203_v16, 0.0  ;;  %v2121_v26 = vld [vmem:[%s3689_s4 + $0xc0] sm:$0xff]  ;;  %v2132_v16 = vld [vmem:[%s3689_s4 + $0x128] sm:$0xff] }
 0x332   : > { %v1243_v13 = vmul.f32 %v3202_v20, %v1210_v8  ;;  %v1244_v12 = vmul.f32 %v3202_v20, %v1211_v43  ;;  %v1351_v4 = vmul.f32 %v2223_v60, %v1350_v37  ;;  %v2129_v55 = vld [vmem:[%s3689_s4 + $0x100] sm:$0xff]  ;;  %v2134_v8 = vld [vmem:[%s3689_s4 + $0x148] sm:$0xff] }
 0x333   : > { %v2133_v43 = vld [vmem:[%s3689_s4 + $0x140] sm:$0xff] }
 0x334   : > { %v1251_v48 = vadd.f32 %v1243_v13, %v1178_v46  ;;  %v1252_v57 = vadd.f32 %v1244_v12, %v1179_v59  ;;  %v1352_v49 = vadd.f32 %v2223_v60, %v1351_v4 }
 0x336   : > { %v1354_v7 = vsel %vm1353_vm11, %v2223_v60, %v1352_v49 }
 0x337   : > { %v1276_v11 = vpop.permute.xlu2 %1275 }
 0x338   : > { %v1284_v41 = vadd.f32 %v1276_v11, %v1251_v48  ;;  %v1285_v50 = vadd.f32 %v1276_v11, %v1252_v57  ;;  %v233_v11 = vld [vmem:[%s3688_s3 + $0x30] sm:$0xff] }
 0x33a   : > { %v3308_v56 = vmul.f32 %v1284_v41, %v1280_v61  ;;  %v3310_v18 = vmul.f32 %v1285_v50, %v1281_v17  ;;  %v234_v61 = vld [vmem:[%s3688_s3 + $0x38] sm:$0xff] }
 0x33c   : > { %1310 = vmatpush.msrb.mxu0 %v3308_v56  ;;  %2190 = vmatpush.msrb.mxu2 %v3308_v56 }
 0x33d   : > { %1333 = vmatpush.msrb.mxu1 %v3310_v18  ;;  %2192 = vmatpush.msrb.mxu3 %v3310_v18 }
 0x33e   : > { %1311 = vmatpush.msrb.mxu0 %v3249_v27  ;;  %2191 = vmatpush.msrb.mxu2 %v3249_v27 }
 0x33f   : > { %1334 = vmatpush.msrb.mxu1 %v3251_v51  ;;  %2193 = vmatpush.msrb.mxu3 %v3251_v51 }
 0x340   : > { %2117 = vmatmul.msk.f32.vlgmr.msrb.gmra.mxu0 %vm565_vm7, %v231_v9  ;;  %2118 = vmatmul.msk.f32.vlgmr.msrb.gmra.mxu2 %vm565_vm7, %v232_v22 }
 0x341   : > { %2119 = vmatmul.msk.f32.vlgmr.msrb.gmra.mxu1 %vm565_vm7, %v231_v9  ;;  %2120 = vmatmul.msk.f32.vlgmr.msrb.gmra.mxu3 %vm565_vm7, %v232_v22 }
 0x3bd   : > { %v1313_v20 = vpop.f32.mrf.mxu0 }
 0x3be   : > { %v1336_v62 = vpop.f32.mrf.mxu1 }
 0x3bf   : > { %v1342_v52 = vadd.f32 %v1336_v62, %v1313_v20 }
 0x3c1   : > { %1343 = vadd.xlane.f32.xlu0 %v1342_v52 }
 0x3c3   : > { %v1316_v29 = vpop.f32.mrf.mxu2 }
 0x3c4   : > { %v1339_v28 = vpop.f32.mrf.mxu3 }
 0x3c5   : > { %v1345_v21 = vadd.f32 %v1339_v28, %v1316_v29 }
 0x3c7   : > { %1346 = vadd.xlane.f32.xlu2 %v1345_v21 }
 0x3d5   : > { %1536 = vperm.xlu0 %2215, %v2131_v31  }
 0x3dd   : > { %1584 = vperm.xlu0 %2215, %v2138_v47   ;;  %v3797_v47 = vld [vmem:[#allocation3_spill] sm:$0xff] }
 0x3df   : > { %1451 = vperm.xlu2 %2214, %v2130_v40  }
 0x3e5   : > { %1671 = vperm.xlu0 %2215, %v2148_v39   ;;  %v3798_v39 = vld [vmem:[#allocation2_spill] sm:$0xff] }
 0x3e7   : > { %1574 = vperm.xlu2 %2214, %v2136_v32  }
 0x3ed   : > { %1731 = vperm.xlu0 %2215, %v2153_v30   ;;  %v3799_v30 = vld [vmem:[#allocation4_spill] sm:$0xff] }
 0x3ef   : > { %1579 = vperm.xlu2 %2214, %v2137_v63  }
 0x3f7   : > { %1736 = vperm.xlu2 %2214, %v2154_v15   ;;  %v3800_v15 = vld [vmem:[#allocation5_spill] sm:$0xff] }
 0x434   : > { %v1344_v54 = vpop.xlane.xlu0 %1343 }
 0x435   : > { %v1355_v23 = vmul.f32 %v1354_v7, %v1344_v54 }
 0x437   : > { %v1360_v1 = vadd.f32 %v2121_v26, %v1355_v23 }
 0x43a   : > { %v1347_v10 = vpop.xlane.xlu2 %1346 }
 0x43b   : > { %v1356_v2 = vmul.f32 %v1354_v7, %v1347_v10 }
 0x43d   : > { %v1361_v53 = vadd.f32 %v2122_v25, %v1356_v2 }
 0x43f   : > { %1369 = vperm.xlu1 %2213, %v1361_v53  }
 0x442   : > { %v1452_v28 = vpop.permute.xlu2 %1451 }
 0x447   : > { %1364 = vperm.xlu1 %2213, %v1360_v1  }
 0x44f   : > { %1381 = vperm.xlu1 %2213, %v2123_v5   ;;  %v3801_v5 = vld [vmem:[#allocation6_spill] sm:$0xff] }
 0x457   : > { %1386 = vperm.xlu1 %2213, %v2124_v42  }
 0x45f   : > { %1446 = vperm.xlu1 %2213, %v2129_v55  }
 0x467   : > { %1541 = vperm.xlu1 %2213, %v2132_v16  }
 0x46f   : > { %1555 = vperm.xlu1 %2213, %v2134_v8  }
 0x477   : > { %1550 = vperm.xlu1 %2213, %v2133_v43  }
 0x47f   : > { %1569 = vperm.xlu1 %2213, %v2135_v36  }
 0x487   : > { %1666 = vperm.xlu1 %2213, %v2147_v3  }
 0x4b1   : > { %v1370_v13 = vpop.permute.xlu1 %1369 }
 0x4b2   : > { %v1374_v12 = vmul.f32 %v1370_v13, %v3308_v56  ;;  %v1375_v46 = vmul.f32 %v1370_v13, %v3310_v18 }
 0x4b4   : > { %1409 = vmatpush.msra.mxu2 %v1374_v12  ;;  %1432 = vmatpush.msra.mxu3 %v1375_v46 }
 0x4b9   : > { %v1365_v59 = vpop.permute.xlu1 %1364 }
 0x4ba   : > { %v1372_v48 = vmul.f32 %v1365_v59, %v3249_v27  ;;  %v1373_v57 = vmul.f32 %v1365_v59, %v3251_v51 }
 0x4bc   : > { %1410 = vmatpush.msra.mxu2 %v1372_v48  ;;  %1433 = vmatpush.msra.mxu3 %v1373_v57 }
 0x4bd   : > { %2125 = vmatmul.msk.f32.vlgmr.msra.gmra.mxu2 %vm565_vm7, %v233_v11  ;;  %2127 = vmatmul.msk.f32.vlgmr.msra.gmra.mxu3 %vm565_vm7, %v233_v11 }
 0x4c1   : > { %v1382_v27 = vpop.permute.xlu1 %1381 }
 0x4c5   : > { %2126 = vmatmul.msk.f32.gmra.mxu2 %vm565_vm7, %v234_v61  ;;  %2128 = vmatmul.msk.f32.gmra.mxu3 %vm565_vm7, %v234_v61 }
 0x4c9   : > { %v1387_v51 = vpop.permute.xlu1 %1386 }
 0x4d1   : > { %v1447_v18 = vpop.permute.xlu1 %1446 }
 0x540   : > { %v1412_v17 = vpop.f32.mrf.mxu2  ;;  %v1435_v41 = vpop.f32.mrf.mxu3 }
 0x541   : > { %v1413_v50 = vadd.f32 %v1412_v17, %v1382_v27  ;;  %v1436_v56 = vadd.f32 %v1435_v41, %v1382_v27 }
 0x543   : > { %v1454_v20 = vmul.f32 %v1447_v18, %v1413_v50  ;;  %v1455_v62 = vmul.f32 %v1447_v18, %v1436_v56 }
 0x545   : > { %v3399_v40 = vadd.f32 %v1454_v20, %v3797_v47  ;;  %v3402_v32 = vadd.f32 %v1455_v62, %v3798_v39 }
 0x548   : > { %v1415_v9 = vpop.f32.mrf.mxu2  ;;  %v1438_v22 = vpop.f32.mrf.mxu3 }
 0x549   : > { %v1416_v52 = vadd.f32 %v1415_v9, %v1387_v51  ;;  %v1439_v29 = vadd.f32 %v1438_v22, %v1387_v51 }
 0x54b   : > { %v1456_v21 = vmul.f32 %v1452_v28, %v1416_v52  ;;  %v1457_v31 = vmul.f32 %v1452_v28, %v1439_v29  ;;  %v1542_v28 = vpop.permute.xlu1 %1541 }
 0x54d   : > { %v3405_v63 = vadd.f32 %v1456_v21, %v3799_v30  ;;  %v3408_v58 = vadd.f32 %v1457_v31, %v3800_v15 }
 0x54f   : > { %v1468_v60 = vadd.f32 %v3405_v63, %v3399_v40  ;;  %v1475_v6 = vadd.f32 %v3408_v58, %v3402_v32 }
 0x551   : > { %v1469_v37 = vrot.slane %v1468_v60, 4  ;;  %v1476_v4 = vrot.slane %v1475_v6, 4 }
 0x553   : > { %v1470_v49 = vadd.f32 %v1469_v37, %v1468_v60  ;;  %v1477_v7 = vadd.f32 %v1476_v4, %v1475_v6  ;;  %v1556_v37 = vpop.permute.xlu1 %1555 }
 0x555   : > { %v1471_v25 = vrot.slane %v1470_v49, 2  ;;  %v1478_v10 = vrot.slane %v1477_v7, 2 }
 0x557   : > { %v1472_v2 = vadd.f32 %v1471_v25, %v1470_v49  ;;  %v1479_v53 = vadd.f32 %v1478_v10, %v1477_v7 }
 0x559   : > { %v1473_v54 = vrot.slane %v1472_v2, 1  ;;  %v1480_v23 = vrot.slane %v1479_v53, 1 }
 0x55b   : > { %v1474_v26 = vadd.f32 %v1473_v54, %v1472_v2  ;;  %v1481_v1 = vadd.f32 %v1480_v23, %v1479_v53  ;;  %v1537_v23 = vpop.permute.xlu0 %1536 }
 0x55d   : > { %v1482_v42 = vmul.f32 %v1474_v26, %v3801_v5  ;;  %v1483_v55 = vmul.f32 %v1481_v1, %v3801_v5 }
 0x55f   : > { %v1484_v16 = vsub.f32 %v3399_v40, %v1482_v42  ;;  %v1486_v8 = vsub.f32 %v3405_v63, %v1482_v42  ;;  %v1485_v43 = vsub.f32 %v3402_v32, %v1483_v55  ;;  %v1487_v36 = vsub.f32 %v3408_v58, %v1483_v55 }
 0x561   : > { %v1488_v3 = vmul.f32 %v1484_v16, %v1484_v16  ;;  %v1490_v13 = vmul.f32 %v1486_v8, %v1486_v8  ;;  %v1489_v12 = vmul.f32 %v1485_v43, %v1485_v43  ;;  %v1491_v46 = vmul.f32 %v1487_v36, %v1487_v36 }
 0x563   : > { %v1492_v59 = vadd.f32 %v1490_v13, %v1488_v3  ;;  %v1499_v48 = vadd.f32 %v1491_v46, %v1489_v12  ;;  %v1551_v12 = vpop.permute.xlu1 %1550 }
 0x565   : > { %v1493_v57 = vrot.slane %v1492_v59, 4  ;;  %v1500_v11 = vrot.slane %v1499_v48, 4 }
 0x567   : > { %v1494_v61 = vadd.f32 %v1493_v57, %v1492_v59  ;;  %v1501_v27 = vadd.f32 %v1500_v11, %v1499_v48  ;;  %v235_v48 = vld [vmem:[%s3688_s3 + $0x40] sm:$0xff] }
 0x569   : > { %v1495_v51 = vrot.slane %v1494_v61, 2  ;;  %v1502_v17 = vrot.slane %v1501_v27, 2 }
 0x56b   : > { %v1496_v41 = vadd.f32 %v1495_v51, %v1494_v61  ;;  %v1503_v50 = vadd.f32 %v1502_v17, %v1501_v27  ;;  %v1575_v51 = vpop.permute.xlu2 %1574 }
 0x56d   : > { %v1497_v56 = vrot.slane %v1496_v41, 1  ;;  %v1504_v18 = vrot.slane %v1503_v50, 1 }
 0x56f   : > { %v1498_v9 = vadd.f32 %v1497_v56, %v1496_v41  ;;  %v1505_v22 = vadd.f32 %v1504_v18, %v1503_v50  ;;  %v1585_v50 = vpop.permute.xlu0 %1584 }
 0x571   : > { %v1506_v20 = vmul.f32 %v1498_v9, %v3801_v5  ;;  %v1507_v62 = vmul.f32 %v1505_v22, %v3801_v5 }
 0x573   : > { %v1508_v52 = vadd.f32 1e-06, %v1506_v20  ;;  %v1509_v29 = vadd.f32 1e-06, %v1507_v62  ;;  %v1580_v56 = vpop.permute.xlu2 %1579 }
 0x575   : > { %2224 = vrsqrt.f32 %v1508_v52  ;;  %vm1516_vm6 = vweird.f32 %v1508_v52  ;;  %vm1526_vm11 = vweird.f32 %v1509_v29 }
 0x576   : > { %2226 = vrsqrt.f32 %v1509_v29 }
 0x57b   : > { %v2225_v21 = vpop.eup %2224 }
 0x57c   : > { %v2227_v31 = vpop.eup %2226  ;;  %v1511_v47 = vmul.f32 %v2225_v21, %v1508_v52  ;;  %vm1517_vm12 = vweird.f32 %v2225_v21  ;;  %v1570_v52 = vpop.permute.xlu1 %1569 }
 0x57d   : > { %v1521_v39 = vmul.f32 %v2227_v31, %v1509_v29  ;;  %vm1527_vm13 = vweird.f32 %v2227_v31  ;;  %vm1518_vm10 = vmor %vm1516_vm6, %vm1517_vm12 }
 0x57e   : > { %v1512_v30 = vmul.f32 %v2225_v21, %v1511_v47  ;;  %vm1528_vm2 = vmor %vm1526_vm11, %vm1527_vm13  ;;  %vm3804_vm13 = vcmp.lt.s32.totalorder %v2390_v24, 240 }
 0x57f   : > { %v1522_v15 = vmul.f32 %v2227_v31, %v1521_v39  ;;  %vm3807_vm11 = vmmov %vm3804_vm13 }
 0x580   : > { %v1513_v60 = vmul.f32 0.5, %v1512_v30 }
 0x581   : > { %v1523_v6 = vmul.f32 0.5, %v1522_v15 }
 0x582   : > { %v1514_v4 = vsub.f32 1.5, %v1513_v60  ;;  %v239_v60 = vld [vmem:[%s3688_s3 + $0x60] sm:$0xff] }
 0x583   : > { %v1524_v49 = vsub.f32 1.5, %v1523_v6 }
 0x584   : > { %v1515_v7 = vmul.f32 %v2225_v21, %v1514_v4  ;;  %v1672_v4 = vpop.permute.xlu0 %1671 }
 0x585   : > { %v1525_v25 = vmul.f32 %v2227_v31, %v1524_v49  ;;  %v1667_v49 = vpop.permute.xlu1 %1666 }
 0x586   : > { %v1519_v10 = vsel %vm1518_vm10, %v2225_v21, %v1515_v7 }
 0x587   : > { %v1532_v2 = vmul.f32 %v1519_v10, %v1486_v8  ;;  %v1529_v53 = vsel %vm1528_vm2, %v2227_v31, %v1525_v25  ;;  %v1530_v54 = vmul.f32 %v1519_v10, %v1484_v16  ;;  %v236_v16 = vld [vmem:[%s3688_s3 + $0x48] sm:$0xff]  ;;  %vm3802_vm2 = vcmp.lt.s32.totalorder %v2378_v19, 112 }
 0x588   : > { %v1533_v26 = vmul.f32 %v1529_v53, %v1487_v36  ;;  %v1531_v1 = vmul.f32 %v1529_v53, %v1485_v43  ;;  %v237_v43 = vld [vmem:[%s3688_s3 + $0x50] sm:$0xff]  ;;  %v238_v36 = vld [vmem:[%s3688_s3 + $0x58] sm:$0xff]  ;;  %vm3803_vm12 = vmmov %vm3802_vm2 }
 0x589   : > { %v1546_v5 = vmul.f32 %v1542_v28, %v1532_v2  ;;  %v1544_v42 = vmul.f32 %v1537_v23, %v1530_v54  ;;  %vm3805_vm6 = vmmov %vm3802_vm2 }
 0x58a   : > { %v1547_v55 = vmul.f32 %v1542_v28, %v1533_v26  ;;  %v1545_v3 = vmul.f32 %v1537_v23, %v1531_v1  ;;  %vm3806_vm10 = vmmov %vm3802_vm2 }
 0x58b   : > { %v1560_v13 = vadd.f32 %v1556_v37, %v1546_v5  ;;  %v1558_v59 = vadd.f32 %v1551_v12, %v1544_v42  ;;  %v1737_v5 = vpop.permute.xlu2 %1736 }
 0x58c   : > { %v1561_v46 = vadd.f32 %v1556_v37, %v1547_v55  ;;  %v1559_v8 = vadd.f32 %v1551_v12, %v1545_v3  ;;  %v240_v37 = vld [vmem:[%s3688_s3 + $0x68] sm:$0xff]  ;;  %v1732_v2 = vpop.permute.xlu0 %1731 }
 0x58d   : > { %1613 = vmatpush.msra.mxu0 %v1560_v13 }
 0x58e   : > { %1642 = vmatpush.msra.mxu1 %v1561_v46 }
 0x58f   : > { %1614 = vmatpush.msra.mxu0 %v1558_v59 }
 0x590   : > { %1643 = vmatpush.msra.mxu1 %v1559_v8  ;;  %2139 = vmatmul.msk.f32.vlgmr.msra.gmra.mxu0 %vm565_vm7, %v235_v48 }
 0x591   : > { %2143 = vmatmul.msk.f32.vlgmr.msra.gmra.mxu1 %vm565_vm7, %v235_v48 }
 0x598   : > { %2140 = vmatmul.msk.f32.gmra.mxu0 %vm565_vm7, %v236_v16 }
 0x599   : > { %2144 = vmatmul.msk.f32.gmra.mxu1 %vm565_vm7, %v236_v16 }
 0x5a0   : > { %2141 = vmatmul.msk.f32.gmra.mxu0 %vm565_vm7, %v237_v43 }
 0x5a1   : > { %2145 = vmatmul.msk.f32.gmra.mxu1 %vm565_vm7, %v237_v43 }
 0x5a8   : > { %2142 = vmatmul.msk.f32.gmra.mxu0 %vm565_vm7, %v238_v36 }
 0x5a9   : > { %2146 = vmatmul.msk.f32.gmra.mxu1 %vm565_vm7, %v238_v36 }
 0x60d   : > { %v1616_v57 = vpop.f32.mrf.mxu0 }
 0x60e   : > { %v1645_v11 = vpop.f32.mrf.mxu1  ;;  %v1617_v31 = vadd.f32 %v1616_v57, %v1570_v52 }
 0x60f   : > { %v1646_v39 = vadd.f32 %v1645_v11, %v1570_v52 }
 0x615   : > { %v1619_v61 = vpop.f32.mrf.mxu0 }
 0x616   : > { %v1648_v27 = vpop.f32.mrf.mxu1  ;;  %v1620_v9 = vadd.f32 %v1619_v61, %v1575_v51 }
 0x617   : > { %v1649_v29 = vadd.f32 %v1648_v27, %v1575_v51 }
 0x61d   : > { %v1622_v17 = vpop.f32.mrf.mxu0 }
 0x61e   : > { %v1651_v41 = vpop.f32.mrf.mxu1  ;;  %v1623_v22 = vadd.f32 %v1622_v17, %v1580_v56 }
 0x61f   : > { %v1652_v28 = vadd.f32 %v1651_v41, %v1580_v56 }
 0x620   : > { %v1657_v15 = vmul.f32 %v1623_v22, %v1617_v31 }
 0x621   : > { %v1658_v6 = vmul.f32 %v1652_v28, %v1646_v39 }
 0x625   : > { %v1625_v18 = vpop.f32.mrf.mxu0 }
 0x626   : > { %v1626_v20 = vadd.f32 %v1625_v18, %v1585_v50  ;;  %v1654_v62 = vpop.f32.mrf.mxu1  ;;  %v1747_v18 = vld [vmem:[%s3687_s2] sm:$0x77] }
 0x627   : > { %v1655_v21 = vadd.f32 %v1654_v62, %v1585_v50  ;;  %1884 = vst [vmem:[#allocation1] ss:$2 sm:$0xff] %v1747_v18 }
 0x628   : > { %v1659_v47 = vmul.f32 %v1626_v20, %v1620_v9 }
 0x629   : > { %v1660_v30 = vmul.f32 %v1655_v21, %v1649_v29 }
 0x62a   : > { %1694 = vmatpush.msrb.mxu2 %v1659_v47 }
 0x62b   : > { %1717 = vmatpush.msrb.mxu3 %v1660_v30 }
 0x62c   : > { %1695 = vmatpush.msrb.mxu2 %v1657_v15 }
 0x62d   : > { %1718 = vmatpush.msrb.mxu3 %v1658_v6  ;;  %2149 = vmatmul.msk.f32.vlgmr.msrb.gmra.mxu2 %vm565_vm7, %v239_v60 }
 0x62e   : > { %2151 = vmatmul.msk.f32.vlgmr.msrb.gmra.mxu3 %vm565_vm7, %v239_v60 }
 0x635   : > { %2150 = vmatmul.msk.f32.gmra.mxu2 %vm565_vm7, %v240_v37 }
 0x636   : > { %2152 = vmatmul.msk.f32.gmra.mxu3 %vm565_vm7, %v240_v37 }
 0x6b0   : > { %v1697_v7 = vpop.f32.mrf.mxu2 }
 0x6b1   : > { %v1698_v25 = vadd.f32 %v1697_v7, %v1667_v49  ;;  %v1720_v10 = vpop.f32.mrf.mxu3 }
 0x6b2   : > { %v1721_v53 = vadd.f32 %v1720_v10, %v1667_v49 }
 0x6b3   : > { %v1739_v54 = vmul.f32 %v1732_v2, %v1698_v25 }
 0x6b4   : > { %v1740_v23 = vmul.f32 %v1732_v2, %v1721_v53 }
 0x6b5   : > { %v3453_v26 = vadd.f32 %v1739_v54, %v3399_v40 }
 0x6b6   : > { %v3456_v1 = vadd.f32 %v1740_v23, %v3402_v32 }
 0x6b7   : > { %1844 = vrot.lane.b32.xlu0 %v3453_v26, %s2238_s24 }
 0x6b8   : > { %1832 = vrot.lane.b32.xlu2 %v3456_v1, %s2240_s26  ;;  %1848 = vrot.lane.b32.xlu1 %v3456_v1, %s2238_s24  ;;  %v1700_v55 = vpop.f32.mrf.mxu2 }
 0x6b9   : > { %v1723_v40 = vpop.f32.mrf.mxu3  ;;  %v1701_v3 = vadd.f32 %v1700_v55, %v1672_v4 }
 0x6ba   : > { %v1724_v32 = vadd.f32 %v1723_v40, %v1672_v4  ;;  %v1886_v40 = vld.sshfl [vmem:[#allocation1 + $0x8] sm:$0xff pattern:$0x75316420] }
 0x6bb   : > { %v1741_v12 = vmul.f32 %v1737_v5, %v1701_v3 }
 0x6bc   : > { %v1742_v42 = vmul.f32 %v1737_v5, %v1724_v32 }
 0x6bd   : > { %v3492_v46 = vadd.f32 %v1741_v12, %v3405_v63  ;;  %v2155_v63 = vld [vmem:[%s3689_s4 + $0x20] sm:$0x7] }
 0x6be   : > { %v3483_v13 = vadd.f32 %v1742_v42, %v3408_v58 }
 0x6bf   : > { %1816 = vrot.lane.b32.xlu0 %v3456_v1, %s2242_s27 }
 0x6c0   : > { %1812 = vrot.lane.b32.xlu2 %v3453_v26, %s2242_s27  ;;  %1828 = vrot.lane.b32.xlu1 %v3453_v26, %s2240_s26 }
 0x6c7   : > { %1796 = vrot.lane.b32.xlu0 %v3453_v26, %s2243_s28 }
 0x6c8   : > { %1784 = vrot.lane.b32.xlu2 %v3456_v1, %s2244_s29  ;;  %1800 = vrot.lane.b32.xlu1 %v3456_v1, %s2243_s28 }
 0x6cf   : > { %1860 = vrot.lane.b32.xlu0 %v3453_v26, %s2239_s25 }
 0x6d0   : > { %1768 = vrot.lane.b32.xlu2 %v3456_v1, %s2245_s30  ;;  %1780 = vrot.lane.b32.xlu1 %v3453_v26, %s2244_s29 }
 0x6d7   : > { %1834 = vrot.lane.b32.xlu0 %v3483_v13, %s2240_s26 }
 0x6d8   : > { %1850 = vrot.lane.b32.xlu2 %v3483_v13, %s2238_s24  ;;  %1764 = vrot.lane.b32.xlu1 %v3453_v26, %s2245_s30 }
 0x6df   : > { %1814 = vrot.lane.b32.xlu0 %v3492_v46, %s2242_s27 }
 0x6e0   : > { %1830 = vrot.lane.b32.xlu2 %v3492_v46, %s2240_s26  ;;  %1864 = vrot.lane.b32.xlu1 %v3456_v1, %s2239_s25 }
 0x6e7   : > { %1786 = vrot.lane.b32.xlu0 %v3483_v13, %s2244_s29 }
 0x6e8   : > { %1802 = vrot.lane.b32.xlu2 %v3483_v13, %s2243_s28  ;;  %1846 = vrot.lane.b32.xlu1 %v3492_v46, %s2238_s24 }
 0x6ef   : > { %1766 = vrot.lane.b32.xlu0 %v3492_v46, %s2245_s30 }
 0x6f0   : > { %1782 = vrot.lane.b32.xlu2 %v3492_v46, %s2244_s29  ;;  %1818 = vrot.lane.b32.xlu1 %v3483_v13, %s2242_s27 }
 0x6f7   : > { %1866 = vrot.lane.b32.xlu0 %v3483_v13, %s2239_s25 }
 0x6f8   : > { %1862 = vrot.lane.b32.xlu2 %v3492_v46, %s2239_s25  ;;  %1798 = vrot.lane.b32.xlu1 %v3492_v46, %s2243_s28  ;;  %s2189_s28 = sshll.u32 %s3835_s19, 3 }
 0x6ff   : > { %1754 = vrot.lane.b32.xlu0 %v3483_v13, %s2246_s6 }
 0x700   : > { %1750 = vrot.lane.b32.xlu2 %v3492_v46, %s2246_s6  ;;  %1770 = vrot.lane.b32.xlu1 %v3483_v13, %s2245_s30 }
 0x707   : > { %1880 = vperm.xlu0 %2215, %v2155_v63  }
 0x708   : > { %1752 = vrot.lane.b32.xlu2 %v3456_v1, %s2246_s6  ;;  %1748 = vrot.lane.b32.xlu1 %v3453_v26, %s2246_s6  ;;  %s224_s6 = scalar_lea.vmem %s3690_s5, %s2189_s28 }
 0x712   : > { %v1833_v58 = vpop.permute.xlu2 %1832 }
 0x71a   : > { %v1813_v59 = vpop.permute.xlu2 %1812 }
 0x722   : > { %v3531_v8 = vpop.permute.xlu2 %1784 }
 0x729   : > { %v1845_v48 = vpop.permute.xlu0 %1844 }
 0x72a   : > { %v1849_v16 = vpop.permute.xlu1 %1848  ;;  %v3533_v57 = vpop.permute.xlu2 %1768 }
 0x72b   : > { %v1854_v31 = vsel %vm3805_vm6, %v1849_v16, %v1845_v48  ;;  %v1852_v47 = vsel %vm3806_vm10, %v1845_v48, %v1849_v16  ;;  %vm3812_vm10 = vcmp.lt.s32.totalorder %v2378_v19, 127 }
 0x731   : > { %v1817_v43 = vpop.permute.xlu0 %1816 }
 0x732   : > { %v1829_v36 = vpop.permute.xlu1 %1828  ;;  %v1851_v27 = vpop.permute.xlu2 %1850 }
 0x739   : > { %v1797_v11 = vpop.permute.xlu0 %1796 }
 0x73a   : > { %v1801_v61 = vpop.permute.xlu1 %1800  ;;  %v1831_v41 = vpop.permute.xlu2 %1830 }
 0x741   : > { %v1861_v51 = vpop.permute.xlu0 %1860 }
 0x742   : > { %v3535_v17 = vpop.permute.xlu1 %1780  ;;  %v1803_v22 = vpop.permute.xlu2 %1802 }
 0x749   : > { %v1835_v50 = vpop.permute.xlu0 %1834 }
 0x74a   : > { %v3537_v56 = vpop.permute.xlu1 %1764  ;;  %v1783_v21 = vpop.permute.xlu2 %1782 }
 0x74b   : > { %v1774_v0 = vsel %vm281_vm15, %v3533_v57, %v3537_v56  ;;  %v1772_v33 = vsel %vm281_vm15, %v3537_v56, %v3533_v57 }
 0x751   : > { %v1815_v9 = vpop.permute.xlu0 %1814 }
 0x752   : > { %v1865_v20 = vpop.permute.xlu1 %1864  ;;  %v1863_v45 = vpop.permute.xlu2 %1862 }
 0x759   : > { %v1787_v62 = vpop.permute.xlu0 %1786 }
 0x75a   : > { %v1847_v52 = vpop.permute.xlu1 %1846  ;;  %v1751_v34 = vpop.permute.xlu2 %1750 }
 0x75b   : > { %v1853_v29 = vsel %vm3802_vm2, %v1847_v52, %v1851_v27  ;;  %v1855_v28 = vsel %vm3803_vm12, %v1851_v27, %v1847_v52  ;;  %vm3808_vm2 = vcmp.lt.s32.totalorder %v2378_v19, 113 }
 0x75c   : > { %1890 = vmatpush.msrb.mxu0 %v1853_v29  ;;  %2171 = vmatpush.msk.msrb.mxu1 %vm3804_vm13, %v1855_v28  ;;  %v1837_v39 = vsel %vm3808_vm2, %v1831_v41, %v1835_v50  ;;  %vm3809_vm12 = vmmov %vm3808_vm2 }
 0x75d   : > { %v1839_v30 = vsel %vm3809_vm12, %v1835_v50, %v1831_v41  ;;  %vm3810_vm13 = vmmov %vm3808_vm2  ;;  %v2228_v50 = vld [vmem:[%s2293_s23 + $0x8] sm:$0xff] }
 0x75e   : > { %1891 = vmatpush.msrb.mxu0 %v1852_v47  ;;  %2172 = vmatpush.msk.msrb.mxu1 %vm3807_vm11, %v1854_v31  ;;  %v1836_v15 = vsel %vm3810_vm13, %v1829_v36, %v1833_v58  ;;  %vm3811_vm6 = vmmov %vm3808_vm2 }
 0x75f   : > { %v1838_v60 = vsel %vm3811_vm6, %v1833_v58, %v1829_v36  ;;  %vm3813_vm11 = vmmov %vm3812_vm10  ;;  %vm3818_vm6 = vcmp.lt.s32.totalorder %v2378_v19, 1 }
 0x760   : > { %2156 = vmatpush.msk.msrb.mxu0 %vm2442_vm8, %v1837_v39  ;;  %2173 = vmatpush.msk.msrb.mxu1 %vm2450_vm9, %v1839_v30  ;;  %vm3814_vm2 = vmmov %vm3812_vm10 }
 0x761   : > { %v1767_v24 = vpop.permute.xlu0 %1766  ;;  %v1820_v49 = vsel %vm3814_vm2, %v1813_v59, %v1817_v43  ;;  %vm3815_vm12 = vmmov %vm3814_vm2 }
 0x762   : > { %v1819_v6 = vpop.permute.xlu1 %1818  ;;  %2157 = vmatpush.msk.msrb.mxu0 %vm2442_vm8, %v1836_v15  ;;  %2174 = vmatpush.msk.msrb.mxu1 %vm2450_vm9, %v1838_v60  ;;  %v1822_v7 = vsel %vm3815_vm12, %v1817_v43, %v1813_v59  ;;  %vm3816_vm9 = vcmp.lt.s32.totalorder %v2378_v19, 111  ;;  %vm3822_vm12 = vmmov %vm3818_vm6  ;;  %v1753_v59 = vpop.permute.xlu2 %1752 }
 0x763   : > { %v1821_v37 = vsel %vm3812_vm10, %v1815_v9, %v1819_v6  ;;  %v1823_v4 = vsel %vm3813_vm11, %v1819_v6, %v1815_v9  ;;  %vm3817_vm13 = vmmov %vm3816_vm9  ;;  %v1804_v32 = vsel %vm3822_vm12, %v1797_v11, %v1801_v61 }
 0x764   : > { %2158 = vmatpush.msk.msrb.mxu0 %vm2409_vm3, %v1821_v37  ;;  %2175 = vmatpush.msk.msrb.mxu1 %vm2403_vm0, %v1823_v4  ;;  %vm3819_vm10 = vmmov %vm3818_vm6 }
 0x765   : > { %vm3820_vm11 = vmmov %vm3816_vm9 }
 0x766   : > { %2159 = vmatpush.msk.msrb.mxu0 %vm2409_vm3, %v1820_v49  ;;  %2176 = vmatpush.msk.msrb.mxu1 %vm2403_vm0, %v1822_v7  ;;  %vm3821_vm2 = vmmov %vm3816_vm9 }
 0x768   : > { %1896 = vmatpush.msrb.mxu0 %v3492_v46  ;;  %1936 = vmatpush.msrb.mxu1 %v3483_v13 }
 0x769   : > { %v1867_v25 = vpop.permute.xlu0 %1866 }
 0x76a   : > { %v1799_v10 = vpop.permute.xlu1 %1798  ;;  %1897 = vmatpush.msrb.mxu0 %v3453_v26  ;;  %1937 = vmatpush.msrb.mxu1 %v3456_v1  ;;  %v1869_v2 = vsel %vm3816_vm9, %v1863_v45, %v1867_v25  ;;  %v1871_v53 = vsel %vm3817_vm13, %v1867_v25, %v1863_v45  ;;  %v1868_v26 = vsel %vm3820_vm11, %v1861_v51, %v1865_v20  ;;  %vm3823_vm9 = vmmov %vm3818_vm6  ;;  %vm3824_vm13 = vcmp.lt.s32.totalorder %v2378_v19, 15 }
 0x76b   : > { %v1805_v54 = vsel %vm3818_vm6, %v1799_v10, %v1803_v22  ;;  %v1807_v23 = vsel %vm3819_vm10, %v1803_v22, %v1799_v10  ;;  %2168 = vmatpush.msk.msra.mxu2 %vm2409_vm3, %v1869_v2  ;;  %2183 = vmatpush.msk.msra.mxu3 %vm2417_vm4, %v1871_v53  ;;  %v1870_v1 = vsel %vm3821_vm2, %v1865_v20, %v1861_v51  ;;  %vm3825_vm6 = vmmov %vm3824_vm13  ;;  %vm1975_vm11 = vcmask 1043456  }
 0x76c   : > { %2160 = vmatpush.msk.msrb.mxu0 %vm2442_vm8, %v1807_v23  ;;  %2177 = vmatpush.msk.msrb.mxu1 %vm2421_vm5, %v1805_v54  ;;  %v1806_v5 = vsel %vm3823_vm9, %v1801_v61, %v1797_v11  ;;  %v1789_v42 = vsel %vm3824_vm13, %v1783_v21, %v1787_v62  ;;  %v1791_v55 = vsel %vm3825_vm6, %v1787_v62, %v1783_v21 }
 0x76d   : > { %2169 = vmatpush.msk.msra.mxu2 %vm2409_vm3, %v1868_v26  ;;  %2184 = vmatpush.msk.msra.mxu3 %vm2417_vm4, %v1870_v1  ;;  %vm3826_vm3 = vmmov %vm3825_vm6 }
 0x76e   : > { %2161 = vmatpush.msk.msrb.mxu0 %vm2442_vm8, %v1806_v5  ;;  %2178 = vmatpush.msk.msrb.mxu1 %vm2421_vm5, %v1804_v32  ;;  %v1788_v35 = vsel %vm3826_vm3, %v3535_v17, %v3531_v8  ;;  %vm3827_vm4 = vmmov %vm3826_vm3  ;;  %vm3828_vm8 = vcmp.ge.s32.totalorder %v2378_v19, 16 }
 0x76f   : > { %2170 = vmatmul.msk.f32.vlgmr.msra.gmra.mxu2 %vm565_vm7, %v1886_v40  ;;  %2185 = vmatmul.msk.f32.vlgmr.msra.gmra.mxu3 %vm565_vm7, %v1886_v40  ;;  %v1790_v44 = vsel %vm3827_vm4, %v3531_v8, %v3535_v17  ;;  %v1885_v8 = vld.sshfl [vmem:[#allocation1] sm:$0xff pattern:$0x75316420] }
 0x770   : > { %2162 = vmatpush.msk.msrb.mxu0 %vm2504_vm14, %v1791_v55  ;;  %2179 = vmatpush.msk.msrb.mxu1 %vm2403_vm0, %v1789_v42 }
 0x771   : > { %v1755_v46 = vpop.permute.xlu0 %1754 }
 0x772   : > { %v1771_v3 = vpop.permute.xlu1 %1770  ;;  %2163 = vmatpush.msk.msrb.mxu0 %vm2504_vm14, %v1790_v44  ;;  %2180 = vmatpush.msk.msrb.mxu1 %vm2403_vm0, %v1788_v35  ;;  %vm3829_vm0 = vmmov %vm3828_vm8  ;;  %vm3830_vm14 = vcmp.lt.s32.totalorder %v2378_v19, 17 }
 0x773   : > { %v1775_v13 = vsel %vm281_vm15, %v1771_v3, %v1767_v24  ;;  %v1773_v12 = vsel %vm281_vm15, %v1767_v24, %v1771_v3  ;;  %v1757_v63 = vsel %vm3830_vm14, %v1751_v34, %v1755_v46  ;;  %vm3831_vm7 = vmmov %vm3830_vm14 }
 0x774   : > { %2164 = vmatpush.msk.msrb.mxu0 %vm3828_vm8, %v1775_v13  ;;  %1942 = vmatpush.msrb.mxu1 %v1773_v12  ;;  %v1759_v58 = vsel %vm3831_vm7, %v1755_v46, %v1751_v34  ;;  %vm3832_vm15 = vmmov %vm3831_vm7 }
 0x775   : > { %vm3833_vm10 = vmmov %vm3831_vm7 }
 0x776   : > { %2165 = vmatpush.msk.msrb.mxu0 %vm3829_vm0, %v1774_v0  ;;  %1943 = vmatpush.msrb.mxu1 %v1772_v33 }
 0x778   : > { %2166 = vmatpush.msk.msrb.mxu0 %vm2550_vm1, %v1759_v58  ;;  %2181 = vmatpush.msk.msrb.mxu1 %vm2421_vm5, %v1757_v63 }
 0x779   : > { %v1881_v36 = vpop.permute.xlu0 %1880 }
 0x77a   : > { %v1749_v48 = vpop.permute.xlu1 %1748 }
 0x77b   : > { %v1756_v16 = vsel %vm3832_vm15, %v1749_v48, %v1753_v59  ;;  %v1758_v43 = vsel %vm3833_vm10, %v1753_v59, %v1749_v48 }
 0x77c   : > { %2167 = vmatpush.msk.msrb.mxu0 %vm2550_vm1, %v1758_v43  ;;  %2182 = vmatpush.msk.msrb.mxu1 %vm2421_vm5, %v1756_v16 }
 0x77d   : > { %1906 = vmatmul.f32.vlgmr.msrb.gmra.mxu0 %v1885_v8  ;;  %1946 = vmatmul.f32.vlgmr.msrb.gmra.mxu1 %v1885_v8 }
 0x7f2   : > { %v1927_v57 = vpop.f32.mrf.mxu2  ;;  %v1967_v11 = vpop.f32.mrf.mxu3 }
 0x7fa   : > { %v1907_v61 = vpop.f32.mrf.mxu0  ;;  %v1947_v27 = vpop.f32.mrf.mxu1 }
 0x7fb   : > { %v1908_v51 = vadd.f32 %v1907_v61, %v1881_v36  ;;  %v1948_v17 = vadd.f32 %v1947_v27, %v1881_v36 }
 0x7fd   : > { %v1928_v41 = vadd.f32 %v1927_v57, %v1908_v51  ;;  %v1968_v19 = vadd.f32 %v1967_v11, %v1948_v17 }
 0x7ff   : > { %v1971_v56 = vadd.f32 %v2228_v50, %v1968_v19  ;;  %v1970_v18 = vadd.f32 %v2229_v14, %v1928_v41 }
 0x801   : > { %v1974_v38 = vrot.slane %v1971_v56, 4 }
 0x803   : > { %v1976_v9 = vsel %vm1975_vm11, %v1970_v18, %v1974_v38 }
 0x804   : > { %1978 = vst [vmem:[%s224_s6] sm:$0x77] %v1976_v9 }
 0x805 PF: > { %s15_s18 = sadd.s32 1, %s2236_s18  }
 0x806   : > { %p12_p4 = scmp.ge.s32.totalorder %s15_s18, 4  }
 0x808   :  { %14 = sbr.rel (!%p12_p4) target bundleno = 1 (0x1), region = 92 }

</bundles_post_ra>
